<compile_context>
chip_gen: v6e
topology: v6e:2x2x1
jax: 0.10.0
libtpu: 0.0.40
codegen_flags: <defaults>
</compile_context>

<pallas_src>
import jax
import jax.numpy as jnp
from jax import lax
from jax.experimental import pallas as pl
from jax.experimental.pallas import tpu as pltpu

EPS = 1e-5
DILATIONS = (1, 2, 3, 4)
NUM_BRANCHES = len(DILATIONS) + 2  # 4 dilated temporal branches + maxpool + plain 1x1
NEG = -1e30                        # finite "-inf" pool sentinel (bf16-representable);
                                   # every (3,1) pool window contains >=1 valid row, and
                                   # it only enters the conv matmuls multiplied by exact
                                   # 0.0 weights, so it never produces NaN/garbage.


# ---------------------------------------------------------------------------
# Fused Pallas kernel
# ---------------------------------------------------------------------------
def _make_fused_kernel(T, V, bc, dmax):
    TV = T * V
    HV = dmax * V                      # halo rows on each side of the valid T*V rows
    C4, C5, C6 = 4 * bc, 5 * bc, 6 * bc

    def kernel(x_ref, w1_ref, s1_ref, b1_ref, slope_ref, wt_ref, halo_ref,
               s2d_ref, b2d_ref, s2p_ref, b2p_ref, o_ref, ypad_ref):
        # ---- stage 1: all six 1x1 convs as one matmul + folded BN + LeakyReLU
        y1 = jnp.dot(x_ref[0], w1_ref[...], preferred_element_type=jnp.float32)
        y1 = y1 * s1_ref[...] + b1_ref[...]
        y1 = jnp.where(y1 > 0, y1, y1 * slope_ref[...])           # (TV, 6*bc) f32

        # ---- stage 2 scratch: precomputed halo + bf16 copy of y1 (first 5*bc)
        ypad_ref[0:HV, :] = halo_ref[...]
        ypad_ref[HV + TV:HV + TV + HV, :] = halo_ref[...]
        ypad_ref[HV:HV + TV, :] = y1[:, 0:C5].astype(jnp.bfloat16)

        # ---- 4 dilated (3,1) temporal convs as 9 shift-grouped matmuls ------
        acc = jnp.zeros((TV, C4), jnp.float32)
        for si in range(2 * dmax + 1):                            # static shifts
            xs = ypad_ref[si * V:si * V + TV, :]                  # bf16, no cast
            acc = acc + jnp.dot(xs, wt_ref[si],
                                preferred_element_type=jnp.float32)

        # ---- MaxPool2d((3,1), stride 1, padding (1,0)) branch ---------------
        # slice the bc pool columns before the max (5x less VPU / load work)
        p = jnp.maximum(ypad_ref[HV - V:HV - V + TV, C4:C5],
                        ypad_ref[HV:HV + TV, C4:C5])
        p = jnp.maximum(p, ypad_ref[HV + V:HV + V + TV, C4:C5]).astype(jnp.float32)

        # ---- epilogue: per-branch folded BN affine, in-kernel NCHW transpose,
        #      three direct lane-dense slice stores (no concatenate) ----------
        o_ref[0, 0:C4, :] = jnp.transpose(acc * s2d_ref[...] + b2d_ref[...])
        o_ref[0, C4:C5, :] = jnp.transpose(p * s2p_ref[...] + b2p_ref[...])
        o_ref[0, C5:C6, :] = jnp.transpose(y1[:, C5:C6])          # plain 1x1 branch

    return kernel


# ---------------------------------------------------------------------------
# One-time parameter folding / packing (outside the per-call path)
# ---------------------------------------------------------------------------
def prepare_params(params, V):
    bc = params["w1"][0].shape[1]
    dmax = max(DILATIONS)
    HV = dmax * V
    C4, C5, C6 = 4 * bc, 5 * bc, 6 * bc
    inv_std = 1.0 / jnp.sqrt(1.0 + EPS)

    # Stage-1: concat all six 1x1-conv weights; fold conv bias + BN affine.
    w1_all = jnp.concatenate(params["w1"], axis=1).astype(jnp.bfloat16)   # (Cin, 6*bc)
    s1 = jnp.concatenate([g * inv_std for g in params["g1"]])[None, :]
    b1 = jnp.concatenate([g * inv_std * b + be for g, b, be in
                          zip(params["g1"], params["b1"], params["be1"])])[None, :]
    # LeakyReLU slope: 0.1 for branches 0..4, 1.0 (identity) for the plain 1x1.
    slope = jnp.concatenate([jnp.full((C5,), 0.1, jnp.float32),
                             jnp.ones((bc,), jnp.float32)])[None, :]

    # Stage-2: group the 4 branches' (3,1) dilated-conv taps by temporal shift:
    # one block-diagonal (5*bc, 4*bc) weight per shift s in [-dmax, dmax].
    # INVARIANT: rows C4:C5 (the pool columns of the scratch) MUST stay exactly
    # zero -- the -1e30 pool sentinel flows through these matmuls and is only
    # cancelled because it is multiplied by exact 0.0.
    wt_sh = jnp.zeros((2 * dmax + 1, C5, C4), jnp.float32)
    for i, d in enumerate(DILATIONS):
        for k in range(3):
            s = (k - 1) * d
            wt_sh = wt_sh.at[s + dmax,
                             i * bc:(i + 1) * bc,
                             i * bc:(i + 1) * bc].set(params["wt"][i][k])
    wt_sh = wt_sh.astype(jnp.bfloat16)

    # Precomputed halo block: zeros for conv columns, -1e30 for pool columns.
    halo = jnp.concatenate([jnp.zeros((HV, C4), jnp.float32),
                            jnp.full((HV, bc), NEG, jnp.float32)],
                           axis=1).astype(jnp.bfloat16)

    # Stage-2 folded BN affines (dilated branches and pool branch).
    s2d = jnp.concatenate([g * inv_std for g in params["g2"]])[None, :]
    b2d = jnp.concatenate([g * inv_std * bt + be for g, bt, be in
                           zip(params["g2"], params["bt"], params["be2"])])[None, :]
    s2p = (params["g2_4"] * inv_std)[None, :]
    b2p = params["be2_4"][None, :]

    return dict(bc=bc, w1_all=w1_all, s1=s1, b1=b1, slope=slope, wt_sh=wt_sh,
                halo=halo, s2d=s2d, b2d=b2d, s2p=s2p, b2p=b2p)


# ---------------------------------------------------------------------------
# Forward pass (Pallas hot path; expects packed params from prepare_params)
# ---------------------------------------------------------------------------
def multiscale_temporal_conv_pallas(x_nchw, packed):
    N, Cin, T, V = x_nchw.shape
    bc = packed["bc"]
    dmax = max(DILATIONS)
    TV, HV = T * V, dmax * V
    C4, C5, C6 = 4 * bc, 5 * bc, 6 * bc

    # Channel-last flatten; bf16 cast fused with the relayout (cast first =>
    # half the relayout pass's write traffic).
    x_l = jnp.transpose(x_nchw.astype(jnp.bfloat16), (0, 2, 3, 1)).reshape(N, TV, Cin)

    kernel = _make_fused_kernel(T, V, bc, dmax)

    # Explicit scoped-VMEM budget: double-buffered x/out blocks, resident
    # weights/constants, bf16 scratch, plus f32 temporaries -- with headroom,
    # capped well under v7x's 64 MiB physical VMEM.
    est = (2 * TV * Cin * 2                      # x block, 2 buffers, bf16
           + 2 * TV * C6 * 4                     # out block, 2 buffers, f32
           + Cin * C6 * 2                        # w1_all
           + (2 * dmax + 1) * C5 * C4 * 2        # shift weights
           + HV * C5 * 2                         # halo const
           + (T + 2 * dmax) * V * C5 * 2         # ypad scratch (bf16)
           + TV * (C6 + C4 + C5) * 4)            # y1 / acc / epilogue temporaries
    vmem_limit = int(min(48 * 2 ** 20, max(16 * 2 ** 20, 4 * est)))

    out = pl.pallas_call(
        kernel,
        out_shape=jax.ShapeDtypeStruct((N, C6, TV), jnp.float32),
        grid=(N,),
        in_specs=[
            pl.BlockSpec((1, TV, Cin), lambda n: (n, 0, 0)),          # x (bf16)
            pl.BlockSpec((Cin, C6), lambda n: (0, 0)),                # w1_all (bf16)
            pl.BlockSpec((1, C6), lambda n: (0, 0)),                  # scale1
            pl.BlockSpec((1, C6), lambda n: (0, 0)),                  # bias1
            pl.BlockSpec((1, C6), lambda n: (0, 0)),                  # leaky slope
            pl.BlockSpec((2 * dmax + 1, C5, C4), lambda n: (0, 0, 0)),  # shift weights
            pl.BlockSpec((HV, C5), lambda n: (0, 0)),                 # halo const (bf16)
            pl.BlockSpec((1, C4), lambda n: (0, 0)),                  # scale2 dilated
            pl.BlockSpec((1, C4), lambda n: (0, 0)),                  # bias2 dilated
            pl.BlockSpec((1, bc), lambda n: (0, 0)),                  # scale2 pool
            pl.BlockSpec((1, bc), lambda n: (0, 0)),                  # bias2 pool
        ],
        out_specs=pl.BlockSpec((1, C6, TV), lambda n: (n, 0, 0)),     # lane-dense NC(TV)
        scratch_shapes=[pltpu.VMEM(((T + 2 * dmax) * V, C5), jnp.bfloat16)],
        compiler_params=pltpu.CompilerParams(
            dimension_semantics=("parallel",),
            vmem_limit_bytes=vmem_limit),
    )(x_l, packed["w1_all"], packed["s1"], packed["b1"], packed["slope"],
      packed["wt_sh"], packed["halo"], packed["s2d"], packed["b2d"],
      packed["s2p"], packed["b2p"])

    # (N, C6, T*V) -> (N, C6, T, V): trailing-dim split, metadata-only reshape.
    return out.reshape(N, C6, T, V)


# ---------------------------------------------------------------------------
# Independent pure-JAX reference (for correctness check)
# ---------------------------------------------------------------------------
def multiscale_temporal_conv_ref(x, params):
    inv_std = 1.0 / jnp.sqrt(1.0 + EPS)
    outs = []
    for i in range(NUM_BRANCHES):
        y = jnp.einsum("ncts,cd->ndts", x, params["w1"][i],
                       precision=lax.Precision.HIGHEST)
        y = y + params["b1"][i][None, :, None, None]
        y = params["g1"][i][None, :, None, None] * inv_std * y \
            + params["be1"][i][None, :, None, None]
        if i <= 4:
            y = jnp.where(y > 0, y, 0.1 * y)
        if i < 4:
            d = DILATIONS[i]
            w_oihw = jnp.transpose(params["wt"][i], (2, 1, 0))[..., None]  # (O, I, 3, 1)
            y = lax.conv_general_dilated(y, w_oihw, window_strides=(1, 1),
                                         padding=[(d, d), (0, 0)],
                                         rhs_dilation=(d, 1),
                                         dimension_numbers=("NCHW", "OIHW", "NCHW"),
                                         precision=lax.Precision.HIGHEST)
            y = y + params["bt"][i][None, :, None, None]
            y = params["g2"][i][None, :, None, None] * inv_std * y \
                + params["be2"][i][None, :, None, None]
        elif i == 4:
            y = lax.reduce_window(y, -jnp.inf, lax.max, (1, 1, 3, 1), (1, 1, 1, 1),
                                  [(0, 0), (0, 0), (1, 1), (0, 0)])
            y = params["g2_4"][None, :, None, None] * inv_std * y \
                + params["be2_4"][None, :, None, None]
        outs.append(y)
    return jnp.concatenate(outs, axis=1)


# ---------------------------------------------------------------------------
# Deterministic parameter initialization (shapes as in __init__)
# ---------------------------------------------------------------------------
def init_params(key, in_channels, out_channels):
    bc = out_channels // NUM_BRANCHES
    keys = iter(jax.random.split(key, 64))

    def nrm(shape, s=0.5):
        return s * jax.random.normal(next(keys), shape, dtype=jnp.float32)

    p = {"w1": [], "b1": [], "g1": [], "be1": [],
         "wt": [], "bt": [], "g2": [], "be2": []}
    for _ in range(NUM_BRANCHES):                      # per-branch 1x1 conv + BN
        p["w1"].append(nrm((in_channels, bc)))         # Conv2d(in, bc, 1) weight (transposed)
        p["b1"].append(nrm((bc,), 0.1))
        p["g1"].append(1.0 + nrm((bc,), 0.1))
        p["be1"].append(nrm((bc,), 0.1))
    for _ in DILATIONS:                                # TemporalConv: (3,1) conv + BN
        p["wt"].append(nrm((3, bc, bc)))               # [tap, c_in, c_out]
        p["bt"].append(nrm((bc,), 0.1))
        p["g2"].append(1.0 + nrm((bc,), 0.1))
        p["be2"].append(nrm((bc,), 0.1))
    p["g2_4"] = 1.0 + nrm((bc,), 0.1)                  # BN after MaxPool branch
    p["be2_4"] = nrm((bc,), 0.1)
    return p


if __name__ == "__main__":
    N, Cin, T, V = 2, 8, 16, 8          # (batch, in_channels, time, joints)
    out_channels = 48                   # multiple of 6 branches -> bc = 8

    key = jax.random.PRNGKey(0)
    kx, kp = jax.random.split(key)
    x = jax.random.normal(kx, (N, Cin, T, V), dtype=jnp.float32)
    params = init_params(kp, Cin, out_channels)

    packed = prepare_params(params, V)   # one-time folding/packing, outside the hot path
    fwd = jax.jit(lambda xx: multiscale_temporal_conv_pallas(xx, packed))
    out = jax.block_until_ready(fwd(x))

    ref = multiscale_temporal_conv_ref(x, params)
    assert out.shape == (N, out_channels, T, V), out.shape
    err = float(jnp.max(jnp.abs(out - ref)))
    # bf16 matmul inputs / bf16 pool path with f32 accumulation -> scale-aware tolerance.
    tol = 2e-2 * float(jnp.max(jnp.abs(ref))) + 5e-2
    if not bool(jnp.all(jnp.isfinite(out))) or err > tol:
        raise AssertionError(f"Pallas output mismatch vs reference: "
                             f"max abs err = {err} > tol = {tol}")
    print("KERNEL_OK")
</pallas_src>

<mosaic_0001>
module attributes {stable_mosaic.version = 11 : i64} {
  func.func @kernel(%arg0: i32, %arg1: memref<1x128x8xbf16, #tpu.memory_space<vmem>>, %arg2: memref<8x48xbf16, #tpu.memory_space<vmem>>, %arg3: memref<1x48xf32, #tpu.memory_space<vmem>>, %arg4: memref<1x48xf32, #tpu.memory_space<vmem>>, %arg5: memref<1x48xf32, #tpu.memory_space<vmem>>, %arg6: memref<9x40x32xbf16, #tpu.memory_space<vmem>>, %arg7: memref<32x40xbf16, #tpu.memory_space<vmem>>, %arg8: memref<1x32xf32, #tpu.memory_space<vmem>>, %arg9: memref<1x32xf32, #tpu.memory_space<vmem>>, %arg10: memref<1x8xf32, #tpu.memory_space<vmem>>, %arg11: memref<1x8xf32, #tpu.memory_space<vmem>>, %arg12: memref<1x48x128xf32, #tpu.memory_space<vmem>>, %arg13: memref<192x40xbf16, #tpu.memory_space<vmem>>) attributes {dimension_semantics = [#tpu.dimension_semantics<parallel>], iteration_bounds = array<i64: 2>, scalar_prefetch = 0 : i64, scratch_operands = 1 : i64, tpu.core_type = #tpu.core_type<tc>, window_params = [{transform_indices = @transform_0, window_bounds = array<i64: 1, 128, 8>}, {pipeline_mode = #tpu.pipeline_mode<synchronous>, transform_indices = @transform_1, window_bounds = array<i64: 8, 48>}, {pipeline_mode = #tpu.pipeline_mode<synchronous>, transform_indices = @transform_2, window_bounds = array<i64: 1, 48>}, {pipeline_mode = #tpu.pipeline_mode<synchronous>, transform_indices = @transform_3, window_bounds = array<i64: 1, 48>}, {pipeline_mode = #tpu.pipeline_mode<synchronous>, transform_indices = @transform_4, window_bounds = array<i64: 1, 48>}, {pipeline_mode = #tpu.pipeline_mode<synchronous>, transform_indices = @transform_5, window_bounds = array<i64: 9, 40, 32>}, {pipeline_mode = #tpu.pipeline_mode<synchronous>, transform_indices = @transform_6, window_bounds = array<i64: 32, 40>}, {pipeline_mode = #tpu.pipeline_mode<synchronous>, transform_indices = @transform_7, window_bounds = array<i64: 1, 32>}, {pipeline_mode = #tpu.pipeline_mode<synchronous>, transform_indices = @transform_8, window_bounds = array<i64: 1, 32>}, {pipeline_mode = #tpu.pipeline_mode<synchronous>, transform_indices = @transform_9, window_bounds = array<i64: 1, 8>}, {pipeline_mode = #tpu.pipeline_mode<synchronous>, transform_indices = @transform_10, window_bounds = array<i64: 1, 8>}, {transform_indices = @transform_11, window_bounds = array<i64: 1, 48, 128>}]} {
    %c0 = arith.constant 0 : index
    %c0_0 = arith.constant 0 : index
    %c0_1 = arith.constant 0 : index
    %0 = vector.load %arg1[%c0, %c0_0, %c0_1] : memref<1x128x8xbf16, #tpu.memory_space<vmem>>, vector<1x128x8xbf16>
    %1 = vector.shape_cast %0 : vector<1x128x8xbf16> to vector<128x8xbf16>
    %c0_2 = arith.constant 0 : index
    %c0_3 = arith.constant 0 : index
    %2 = vector.load %arg2[%c0_2, %c0_3] : memref<8x48xbf16, #tpu.memory_space<vmem>>, vector<8x48xbf16>
    %cst = arith.constant dense<0.000000e+00> : vector<128x48xf32>
    %3 = tpu.matmul %1, %2, %cst {dimension_numbers = #tpu.dot_dimension_numbers<[1], [0], [0], [1], [0, 0, 1, 1], [], []>} : vector<128x8xbf16>, vector<8x48xbf16>, vector<128x48xf32> -> vector<128x48xf32>
    %c0_4 = arith.constant 0 : index
    %c0_5 = arith.constant 0 : index
    %4 = vector.load %arg3[%c0_4, %c0_5] : memref<1x48xf32, #tpu.memory_space<vmem>>, vector<1x48xf32>
    %5 = vector.broadcast %4 : vector<1x48xf32> to vector<128x48xf32>
    %6 = arith.mulf %3, %5 : vector<128x48xf32>
    %c0_6 = arith.constant 0 : index
    %c0_7 = arith.constant 0 : index
    %7 = vector.load %arg4[%c0_6, %c0_7] : memref<1x48xf32, #tpu.memory_space<vmem>>, vector<1x48xf32>
    %8 = vector.broadcast %7 : vector<1x48xf32> to vector<128x48xf32>
    %9 = arith.addf %6, %8 : vector<128x48xf32>
    %cst_8 = arith.constant 0.000000e+00 : f32
    %10 = vector.broadcast %cst_8 : f32 to vector<128x48xf32>
    %11 = arith.cmpf ogt, %9, %10 : vector<128x48xf32>
    %c0_9 = arith.constant 0 : index
    %c0_10 = arith.constant 0 : index
    %12 = vector.load %arg5[%c0_9, %c0_10] : memref<1x48xf32, #tpu.memory_space<vmem>>, vector<1x48xf32>
    %13 = vector.broadcast %12 : vector<1x48xf32> to vector<128x48xf32>
    %14 = arith.mulf %9, %13 : vector<128x48xf32>
    %15 = arith.select %11, %9, %14 : vector<128x48xi1>, vector<128x48xf32>
    %c0_11 = arith.constant 0 : index
    %c0_12 = arith.constant 0 : index
    %16 = vector.load %arg7[%c0_11, %c0_12] : memref<32x40xbf16, #tpu.memory_space<vmem>>, vector<32x40xbf16>
    %c0_13 = arith.constant 0 : index
    %c0_14 = arith.constant 0 : index
    %17 = vector.load %arg13[%c0_13, %c0_14] : memref<192x40xbf16, #tpu.memory_space<vmem>>, vector<32x40xbf16>
    tpu.vector_store %arg13[%c0_13, %c0_14], %16 {strides = array<i32>} : memref<192x40xbf16, #tpu.memory_space<vmem>>, vector<32x40xbf16>,
    %c0_15 = arith.constant 0 : index
    %c0_16 = arith.constant 0 : index
    %18 = vector.load %arg7[%c0_15, %c0_16] : memref<32x40xbf16, #tpu.memory_space<vmem>>, vector<32x40xbf16>
    %c160 = arith.constant 160 : index
    %c0_17 = arith.constant 0 : index
    %19 = vector.load %arg13[%c160, %c0_17] : memref<192x40xbf16, #tpu.memory_space<vmem>>, vector<32x40xbf16>
    tpu.vector_store %arg13[%c160, %c0_17], %18 {strides = array<i32>} : memref<192x40xbf16, #tpu.memory_space<vmem>>, vector<32x40xbf16>,
    %20 = vector.extract_strided_slice %15 {offsets = [0, 0], sizes = [128, 40], strides = [1, 1]} : vector<128x48xf32> to vector<128x40xf32>
    %21 = arith.truncf %20 : vector<128x40xf32> to vector<128x40xbf16>
    %c32 = arith.constant 32 : index
    %c0_18 = arith.constant 0 : index
    %22 = vector.load %arg13[%c32, %c0_18] : memref<192x40xbf16, #tpu.memory_space<vmem>>, vector<128x40xbf16>
    tpu.vector_store %arg13[%c32, %c0_18], %21 {strides = array<i32>} : memref<192x40xbf16, #tpu.memory_space<vmem>>, vector<128x40xbf16>,
    %cst_19 = arith.constant 0.000000e+00 : f32
    %23 = vector.broadcast %cst_19 : f32 to vector<128x32xf32>
    %c0_20 = arith.constant 0 : index
    %c0_21 = arith.constant 0 : index
    %24 = vector.load %arg13[%c0_20, %c0_21] : memref<192x40xbf16, #tpu.memory_space<vmem>>, vector<128x40xbf16>
    %c0_22 = arith.constant 0 : index
    %c0_23 = arith.constant 0 : index
    %c0_24 = arith.constant 0 : index
    %25 = vector.load %arg6[%c0_22, %c0_23, %c0_24] : memref<9x40x32xbf16, #tpu.memory_space<vmem>>, vector<1x40x32xbf16>
    %26 = vector.shape_cast %25 : vector<1x40x32xbf16> to vector<40x32xbf16>
    %cst_25 = arith.constant dense<0.000000e+00> : vector<128x32xf32>
    %27 = tpu.matmul %24, %26, %cst_25 {dimension_numbers = #tpu.dot_dimension_numbers<[1], [0], [0], [1], [0, 0, 1, 1], [], []>} : vector<128x40xbf16>, vector<40x32xbf16>, vector<128x32xf32> -> vector<128x32xf32>
    %28 = arith.addf %23, %27 : vector<128x32xf32>
    %c8 = arith.constant 8 : index
    %c0_26 = arith.constant 0 : index
    %29 = vector.load %arg13[%c8, %c0_26] : memref<192x40xbf16, #tpu.memory_space<vmem>>, vector<128x40xbf16>
    %c1 = arith.constant 1 : index
    %c0_27 = arith.constant 0 : index
    %c0_28 = arith.constant 0 : index
    %30 = vector.load %arg6[%c1, %c0_27, %c0_28] : memref<9x40x32xbf16, #tpu.memory_space<vmem>>, vector<1x40x32xbf16>
    %31 = vector.shape_cast %30 : vector<1x40x32xbf16> to vector<40x32xbf16>
    %cst_29 = arith.constant dense<0.000000e+00> : vector<128x32xf32>
    %32 = tpu.matmul %29, %31, %cst_29 {dimension_numbers = #tpu.dot_dimension_numbers<[1], [0], [0], [1], [0, 0, 1, 1], [], []>} : vector<128x40xbf16>, vector<40x32xbf16>, vector<128x32xf32> -> vector<128x32xf32>
    %33 = arith.addf %28, %32 : vector<128x32xf32>
    %c16 = arith.constant 16 : index
    %c0_30 = arith.constant 0 : index
    %34 = vector.load %arg13[%c16, %c0_30] : memref<192x40xbf16, #tpu.memory_space<vmem>>, vector<128x40xbf16>
    %c2 = arith.constant 2 : index
    %c0_31 = arith.constant 0 : index
    %c0_32 = arith.constant 0 : index
    %35 = vector.load %arg6[%c2, %c0_31, %c0_32] : memref<9x40x32xbf16, #tpu.memory_space<vmem>>, vector<1x40x32xbf16>
    %36 = vector.shape_cast %35 : vector<1x40x32xbf16> to vector<40x32xbf16>
    %cst_33 = arith.constant dense<0.000000e+00> : vector<128x32xf32>
    %37 = tpu.matmul %34, %36, %cst_33 {dimension_numbers = #tpu.dot_dimension_numbers<[1], [0], [0], [1], [0, 0, 1, 1], [], []>} : vector<128x40xbf16>, vector<40x32xbf16>, vector<128x32xf32> -> vector<128x32xf32>
    %38 = arith.addf %33, %37 : vector<128x32xf32>
    %c24 = arith.constant 24 : index
    %c0_34 = arith.constant 0 : index
    %39 = vector.load %arg13[%c24, %c0_34] : memref<192x40xbf16, #tpu.memory_space<vmem>>, vector<128x40xbf16>
    %c3 = arith.constant 3 : index
    %c0_35 = arith.constant 0 : index
    %c0_36 = arith.constant 0 : index
    %40 = vector.load %arg6[%c3, %c0_35, %c0_36] : memref<9x40x32xbf16, #tpu.memory_space<vmem>>, vector<1x40x32xbf16>
    %41 = vector.shape_cast %40 : vector<1x40x32xbf16> to vector<40x32xbf16>
    %cst_37 = arith.constant dense<0.000000e+00> : vector<128x32xf32>
    %42 = tpu.matmul %39, %41, %cst_37 {dimension_numbers = #tpu.dot_dimension_numbers<[1], [0], [0], [1], [0, 0, 1, 1], [], []>} : vector<128x40xbf16>, vector<40x32xbf16>, vector<128x32xf32> -> vector<128x32xf32>
    %43 = arith.addf %38, %42 : vector<128x32xf32>
    %c32_38 = arith.constant 32 : index
    %c0_39 = arith.constant 0 : index
    %44 = vector.load %arg13[%c32_38, %c0_39] : memref<192x40xbf16, #tpu.memory_space<vmem>>, vector<128x40xbf16>
    %c4 = arith.constant 4 : index
    %c0_40 = arith.constant 0 : index
    %c0_41 = arith.constant 0 : index
    %45 = vector.load %arg6[%c4, %c0_40, %c0_41] : memref<9x40x32xbf16, #tpu.memory_space<vmem>>, vector<1x40x32xbf16>
    %46 = vector.shape_cast %45 : vector<1x40x32xbf16> to vector<40x32xbf16>
    %cst_42 = arith.constant dense<0.000000e+00> : vector<128x32xf32>
    %47 = tpu.matmul %44, %46, %cst_42 {dimension_numbers = #tpu.dot_dimension_numbers<[1], [0], [0], [1], [0, 0, 1, 1], [], []>} : vector<128x40xbf16>, vector<40x32xbf16>, vector<128x32xf32> -> vector<128x32xf32>
    %48 = arith.addf %43, %47 : vector<128x32xf32>
    %c40 = arith.constant 40 : index
    %c0_43 = arith.constant 0 : index
    %49 = vector.load %arg13[%c40, %c0_43] : memref<192x40xbf16, #tpu.memory_space<vmem>>, vector<128x40xbf16>
    %c5 = arith.constant 5 : index
    %c0_44 = arith.constant 0 : index
    %c0_45 = arith.constant 0 : index
    %50 = vector.load %arg6[%c5, %c0_44, %c0_45] : memref<9x40x32xbf16, #tpu.memory_space<vmem>>, vector<1x40x32xbf16>
    %51 = vector.shape_cast %50 : vector<1x40x32xbf16> to vector<40x32xbf16>
    %cst_46 = arith.constant dense<0.000000e+00> : vector<128x32xf32>
    %52 = tpu.matmul %49, %51, %cst_46 {dimension_numbers = #tpu.dot_dimension_numbers<[1], [0], [0], [1], [0, 0, 1, 1], [], []>} : vector<128x40xbf16>, vector<40x32xbf16>, vector<128x32xf32> -> vector<128x32xf32>
    %53 = arith.addf %48, %52 : vector<128x32xf32>
    %c48 = arith.constant 48 : index
    %c0_47 = arith.constant 0 : index
    %54 = vector.load %arg13[%c48, %c0_47] : memref<192x40xbf16, #tpu.memory_space<vmem>>, vector<128x40xbf16>
    %c6 = arith.constant 6 : index
    %c0_48 = arith.constant 0 : index
    %c0_49 = arith.constant 0 : index
    %55 = vector.load %arg6[%c6, %c0_48, %c0_49] : memref<9x40x32xbf16, #tpu.memory_space<vmem>>, vector<1x40x32xbf16>
    %56 = vector.shape_cast %55 : vector<1x40x32xbf16> to vector<40x32xbf16>
    %cst_50 = arith.constant dense<0.000000e+00> : vector<128x32xf32>
    %57 = tpu.matmul %54, %56, %cst_50 {dimension_numbers = #tpu.dot_dimension_numbers<[1], [0], [0], [1], [0, 0, 1, 1], [], []>} : vector<128x40xbf16>, vector<40x32xbf16>, vector<128x32xf32> -> vector<128x32xf32>
    %58 = arith.addf %53, %57 : vector<128x32xf32>
    %c56 = arith.constant 56 : index
    %c0_51 = arith.constant 0 : index
    %59 = vector.load %arg13[%c56, %c0_51] : memref<192x40xbf16, #tpu.memory_space<vmem>>, vector<128x40xbf16>
    %c7 = arith.constant 7 : index
    %c0_52 = arith.constant 0 : index
    %c0_53 = arith.constant 0 : index
    %60 = vector.load %arg6[%c7, %c0_52, %c0_53] : memref<9x40x32xbf16, #tpu.memory_space<vmem>>, vector<1x40x32xbf16>
    %61 = vector.shape_cast %60 : vector<1x40x32xbf16> to vector<40x32xbf16>
    %cst_54 = arith.constant dense<0.000000e+00> : vector<128x32xf32>
    %62 = tpu.matmul %59, %61, %cst_54 {dimension_numbers = #tpu.dot_dimension_numbers<[1], [0], [0], [1], [0, 0, 1, 1], [], []>} : vector<128x40xbf16>, vector<40x32xbf16>, vector<128x32xf32> -> vector<128x32xf32>
    %63 = arith.addf %58, %62 : vector<128x32xf32>
    %c64 = arith.constant 64 : index
    %c0_55 = arith.constant 0 : index
    %64 = vector.load %arg13[%c64, %c0_55] : memref<192x40xbf16, #tpu.memory_space<vmem>>, vector<128x40xbf16>
    %c8_56 = arith.constant 8 : index
    %c0_57 = arith.constant 0 : index
    %c0_58 = arith.constant 0 : index
    %65 = vector.load %arg6[%c8_56, %c0_57, %c0_58] : memref<9x40x32xbf16, #tpu.memory_space<vmem>>, vector<1x40x32xbf16>
    %66 = vector.shape_cast %65 : vector<1x40x32xbf16> to vector<40x32xbf16>
    %cst_59 = arith.constant dense<0.000000e+00> : vector<128x32xf32>
    %67 = tpu.matmul %64, %66, %cst_59 {dimension_numbers = #tpu.dot_dimension_numbers<[1], [0], [0], [1], [0, 0, 1, 1], [], []>} : vector<128x40xbf16>, vector<40x32xbf16>, vector<128x32xf32> -> vector<128x32xf32>
    %68 = arith.addf %63, %67 : vector<128x32xf32>
    %c24_60 = arith.constant 24 : index
    %c32_61 = arith.constant 32 : index
    %69 = vector.load %arg13[%c24_60, %c32_61] : memref<192x40xbf16, #tpu.memory_space<vmem>>, vector<128x8xbf16>
    %c32_62 = arith.constant 32 : index
    %c32_63 = arith.constant 32 : index
    %70 = vector.load %arg13[%c32_62, %c32_63] : memref<192x40xbf16, #tpu.memory_space<vmem>>, vector<128x8xbf16>
    %71 = arith.maximumf %69, %70 : vector<128x8xbf16>
    %c40_64 = arith.constant 40 : index
    %c32_65 = arith.constant 32 : index
    %72 = vector.load %arg13[%c40_64, %c32_65] : memref<192x40xbf16, #tpu.memory_space<vmem>>, vector<128x8xbf16>
    %73 = arith.maximumf %71, %72 : vector<128x8xbf16>
    %74 = arith.extf %73 : vector<128x8xbf16> to vector<128x8xf32>
    %c0_66 = arith.constant 0 : index
    %c0_67 = arith.constant 0 : index
    %75 = vector.load %arg8[%c0_66, %c0_67] : memref<1x32xf32, #tpu.memory_space<vmem>>, vector<1x32xf32>
    %76 = vector.broadcast %75 : vector<1x32xf32> to vector<128x32xf32>
    %77 = arith.mulf %68, %76 : vector<128x32xf32>
    %c0_68 = arith.constant 0 : index
    %c0_69 = arith.constant 0 : index
    %78 = vector.load %arg9[%c0_68, %c0_69] : memref<1x32xf32, #tpu.memory_space<vmem>>, vector<1x32xf32>
    %79 = vector.broadcast %78 : vector<1x32xf32> to vector<128x32xf32>
    %80 = arith.addf %77, %79 : vector<128x32xf32>
    %81 = tpu.transpose %80, [1, 0] : vector<128x32xf32> -> vector<32x128xf32>
    %c0_70 = arith.constant 0 : index
    %c0_71 = arith.constant 0 : index
    %c0_72 = arith.constant 0 : index
    %82 = vector.load %arg12[%c0_70, %c0_71, %c0_72] : memref<1x48x128xf32, #tpu.memory_space<vmem>>, vector<1x32x128xf32>
    %83 = vector.shape_cast %82 : vector<1x32x128xf32> to vector<32x128xf32>
    %84 = vector.shape_cast %81 : vector<32x128xf32> to vector<1x32x128xf32>
    tpu.vector_store %arg12[%c0_70, %c0_71, %c0_72], %84 {strides = array<i32>} : memref<1x48x128xf32, #tpu.memory_space<vmem>>, vector<1x32x128xf32>,
    %c0_73 = arith.constant 0 : index
    %c0_74 = arith.constant 0 : index
    %85 = vector.load %arg10[%c0_73, %c0_74] : memref<1x8xf32, #tpu.memory_space<vmem>>, vector<1x8xf32>
    %86 = vector.broadcast %85 : vector<1x8xf32> to vector<128x8xf32>
    %87 = arith.mulf %74, %86 : vector<128x8xf32>
    %c0_75 = arith.constant 0 : index
    %c0_76 = arith.constant 0 : index
    %88 = vector.load %arg11[%c0_75, %c0_76] : memref<1x8xf32, #tpu.memory_space<vmem>>, vector<1x8xf32>
    %89 = vector.broadcast %88 : vector<1x8xf32> to vector<128x8xf32>
    %90 = arith.addf %87, %89 : vector<128x8xf32>
    %91 = tpu.transpose %90, [1, 0] : vector<128x8xf32> -> vector<8x128xf32>
    %c0_77 = arith.constant 0 : index
    %c32_78 = arith.constant 32 : index
    %c0_79 = arith.constant 0 : index
    %92 = vector.load %arg12[%c0_77, %c32_78, %c0_79] : memref<1x48x128xf32, #tpu.memory_space<vmem>>, vector<1x8x128xf32>
    %93 = vector.shape_cast %92 : vector<1x8x128xf32> to vector<8x128xf32>
    %94 = vector.shape_cast %91 : vector<8x128xf32> to vector<1x8x128xf32>
    tpu.vector_store %arg12[%c0_77, %c32_78, %c0_79], %94 {strides = array<i32>} : memref<1x48x128xf32, #tpu.memory_space<vmem>>, vector<1x8x128xf32>,
    %95 = vector.extract_strided_slice %15 {offsets = [0, 40], sizes = [128, 8], strides = [1, 1]} : vector<128x48xf32> to vector<128x8xf32>
    %96 = tpu.transpose %95, [1, 0] : vector<128x8xf32> -> vector<8x128xf32>
    %c0_80 = arith.constant 0 : index
    %c40_81 = arith.constant 40 : index
    %c0_82 = arith.constant 0 : index
    %97 = vector.load %arg12[%c0_80, %c40_81, %c0_82] : memref<1x48x128xf32, #tpu.memory_space<vmem>>, vector<1x8x128xf32>
    %98 = vector.shape_cast %97 : vector<1x8x128xf32> to vector<8x128xf32>
    %99 = vector.shape_cast %96 : vector<8x128xf32> to vector<1x8x128xf32>
    tpu.vector_store %arg12[%c0_80, %c40_81, %c0_82], %99 {strides = array<i32>} : memref<1x48x128xf32, #tpu.memory_space<vmem>>, vector<1x8x128xf32>,
    return
  }
  func.func @transform_0(%arg0: i32) -> (i32, i32, i32) {
    %c0_i32 = arith.constant 0 : i32
    %c0_i32_0 = arith.constant 0 : i32
    %c0_i32_1 = arith.constant 0 : i32
    return %arg0, %c0_i32, %c0_i32_0 : i32, i32, i32
  }
  func.func @transform_1(%arg0: i32) -> (i32, i32) {
    %c0_i32 = arith.constant 0 : i32
    %c0_i32_0 = arith.constant 0 : i32
    %c0_i32_1 = arith.constant 0 : i32
    return %c0_i32, %c0_i32_0 : i32, i32
  }
  func.func @transform_2(%arg0: i32) -> (i32, i32) {
    %c0_i32 = arith.constant 0 : i32
    %c0_i32_0 = arith.constant 0 : i32
    %c0_i32_1 = arith.constant 0 : i32
    return %c0_i32, %c0_i32_0 : i32, i32
  }
  func.func @transform_3(%arg0: i32) -> (i32, i32) {
    %c0_i32 = arith.constant 0 : i32
    %c0_i32_0 = arith.constant 0 : i32
    %c0_i32_1 = arith.constant 0 : i32
    return %c0_i32, %c0_i32_0 : i32, i32
  }
  func.func @transform_4(%arg0: i32) -> (i32, i32) {
    %c0_i32 = arith.constant 0 : i32
    %c0_i32_0 = arith.constant 0 : i32
    %c0_i32_1 = arith.constant 0 : i32
    return %c0_i32, %c0_i32_0 : i32, i32
  }
  func.func @transform_5(%arg0: i32) -> (i32, i32, i32) {
    %c0_i32 = arith.constant 0 : i32
    %c0_i32_0 = arith.constant 0 : i32
    %c0_i32_1 = arith.constant 0 : i32
    %c0_i32_2 = arith.constant 0 : i32
    return %c0_i32, %c0_i32_0, %c0_i32_1 : i32, i32, i32
  }
  func.func @transform_6(%arg0: i32) -> (i32, i32) {
    %c0_i32 = arith.constant 0 : i32
    %c0_i32_0 = arith.constant 0 : i32
    %c0_i32_1 = arith.constant 0 : i32
    return %c0_i32, %c0_i32_0 : i32, i32
  }
  func.func @transform_7(%arg0: i32) -> (i32, i32) {
    %c0_i32 = arith.constant 0 : i32
    %c0_i32_0 = arith.constant 0 : i32
    %c0_i32_1 = arith.constant 0 : i32
    return %c0_i32, %c0_i32_0 : i32, i32
  }
  func.func @transform_8(%arg0: i32) -> (i32, i32) {
    %c0_i32 = arith.constant 0 : i32
    %c0_i32_0 = arith.constant 0 : i32
    %c0_i32_1 = arith.constant 0 : i32
    return %c0_i32, %c0_i32_0 : i32, i32
  }
  func.func @transform_9(%arg0: i32) -> (i32, i32) {
    %c0_i32 = arith.constant 0 : i32
    %c0_i32_0 = arith.constant 0 : i32
    %c0_i32_1 = arith.constant 0 : i32
    return %c0_i32, %c0_i32_0 : i32, i32
  }
  func.func @transform_10(%arg0: i32) -> (i32, i32) {
    %c0_i32 = arith.constant 0 : i32
    %c0_i32_0 = arith.constant 0 : i32
    %c0_i32_1 = arith.constant 0 : i32
    return %c0_i32, %c0_i32_0 : i32, i32
  }
  func.func @transform_11(%arg0: i32) -> (i32, i32, i32) {
    %c0_i32 = arith.constant 0 : i32
    %c0_i32_0 = arith.constant 0 : i32
    %c0_i32_1 = arith.constant 0 : i32
    return %arg0, %c0_i32, %c0_i32_0 : i32, i32, i32
  }
}

</mosaic_0001>

<bundles_post_ra>
// kernel: _lambda_.1
= control target key start
LH: loop header
LB: loop body
LE: loop exit
PB: predicated region body
PF: predicated region fallthrough
CT: control target
= control target key end

     0   :  { %s3850_s17 = smov 0   ;;  %s4728_s0 = inlined_call_operand.vmem [shape: bf16[2,128,8], index: 0, kind: input, shape index: {}]   ;;  %s4729_s1 = inlined_call_operand.vmem [shape: bf16[8,48], index: 1, kind: input, shape index: {}]   ;;  %s4730_s2 = inlined_call_operand.vmem [shape: f32[1,48], index: 2, kind: input, shape index: {}]   ;;  %s4731_s3 = inlined_call_operand.vmem [shape: f32[1,48], index: 3, kind: input, shape index: {}]   ;;  %s4732_s4 = inlined_call_operand.vmem [shape: f32[1,48], index: 4, kind: input, shape index: {}]   ;;  %s4733_s5 = inlined_call_operand.vmem [shape: bf16[9,40,32], index: 5, kind: input, shape index: {}]   ;;  %s4734_s6 = inlined_call_operand.vmem [shape: bf16[32,40], index: 6, kind: input, shape index: {}]   ;;  %s4735_s7 = inlined_call_operand.vmem [shape: f32[1,32], index: 7, kind: input, shape index: {}]   ;;  %s4736_s8 = inlined_call_operand.vmem [shape: f32[1,32], index: 8, kind: input, shape index: {}]   ;;  %s4737_s9 = inlined_call_operand.vmem [shape: f32[1,8], index: 9, kind: input, shape index: {}]   ;;  %s4738_s10 = inlined_call_operand.vmem [shape: f32[1,8], index: 10, kind: input, shape index: {}]   ;;  %s4739_s11 = inlined_call_operand.vmem [shape: f32[2,48,128], index: 11, kind: output, shape index: {}]  }
   0x1 LB: > { %s3074_s18 = sadd.s32 4294967295, %s3785_s17   ;;  %p3078_p0 = scmp.ge.s32.totalorder %s3785_s17, 1  ;;  %s3785_s17 = sphi %s3850_s17, %s21_s17  }
   0x2   : > { %p337_p1 = scmp.lt.s32.totalorder %s3785_s17, 3 }
   0x4   : > { %p338_p2 = pnand %p3078_p0, %p337_p1 }
   0x6   : > { %341 = sbr.rel (%p338_p2) target bundleno = 752 (0x2f0), region = 64 }
   0xb   : > { %v404_v0 = vld [vmem:[%s4729_s1] sm:$0xf]  ;;  %vm470_vm0 = vcmask 1043456   ;;  %p377_p3 = scmp.lt.s32.totalorder %s3074_s18, 1  ;;  %s3787_s25 = smov 32   ;;  %vm445_vm1 = vcmask 64512  }
   0xc   : > { %3675 = vmatprep.subr.msk.bf16.mxu0 %vm470_vm0, %v404_v0  ;;  %v472_v1 = vsel %vm470_vm0, %v404_v0, 0  ;;  %v3330_v2 = vld [vmem:[%s4737_s9] ss:$0 sm:$0xff]  ;;  %v3705_v12 = vld [vmem:[%s4733_s5 + $0x10] ss:$0 sps:$4 sm:$0xff]   ;;  %vm676_vm2 = vcmask 322560  }
   0xd   : > { %v3331_v3 = vld [vmem:[%s4738_s10] ss:$0 sm:$0xff]  ;;  %3460 = vmatpush3.bf16.msra.mxu0 %v472_v1  ;;  %s4771_s18 = smov (!%p377_p3, %s3074_s18), 1  ;;  %2781 = vrot.lane.b32.xlu1 %v3330_v2, %s3787_s25  ;;  %v1027_v13 = vsel %vm470_vm0, %v3705_v12, 0  ;;  %v3706_v14 = vld [vmem:[%s4733_s5 + $0x24] ss:$0 sps:$4 sm:$0xff]  }
   0xe   : > { %s3334_s26 = sshll.u32 %s4771_s18, 6  ;;  %3677 = vmatprep.subr.msk.bf16.mxu0 %vm470_vm0, %v3705_v12  ;;  %v672_v15 = vld [vmem:[%s4734_s6] sm:$0xf]  ;;  %v673_v16 = vld [vmem:[%s4734_s6 + $0x4] sm:$0xf]  ;;  %v3707_v17 = vld [vmem:[%s4733_s5 + $0x8] sm:$0xff]   ;;  %3676 = vmatprep.subr.msk.bf16.mxu1 %vm470_vm0, %v3706_v14 }
   0xf   : > { %s381_s29 = scalar_lea.vmem %s4728_s0, %s3334_s26  ;;  %677 = vst.msk [vmem:[#allocation2] sm:$0xf] %vm676_vm2, %v672_v15  ;;  %678 = vst.msk [vmem:[#allocation2 + $0x4] sm:$0xf] %vm676_vm2, %v673_v16  ;;  %v674_v18 = vld [vmem:[%s4734_s6 + $0x8] sm:$0xf] }
  0x10   : > { %v3697_v4 = vld [vmem:[%s381_s29] sm:$0xff]   ;;  %v3698_v5 = vld [vmem:[%s381_s29 + $0x8] sm:$0xff]   ;;  %v3699_v6 = vld [vmem:[%s381_s29 + $0x10] sm:$0xff]   ;;  %v878_v20 = vsel %vm470_vm0, %v3706_v14, 0  ;;  %679 = vst.msk [vmem:[#allocation2 + $0x8] sm:$0xf] %vm676_vm2, %v674_v18 }
  0x11   : > { %2806 = vrot.lane.b32.xlu1 %v3331_v3, %s3787_s25  ;;  %3461 = vmatprep.mubr.msk.bf16.mxu0 %vm445_vm1, %v3697_v4  ;;  %v3700_v7 = vld [vmem:[%s381_s29 + $0x18] sm:$0xff]   ;;  %v3701_v8 = vld [vmem:[%s381_s29 + $0x20] sm:$0xff]   ;;  %v3702_v9 = vld [vmem:[%s381_s29 + $0x28] sm:$0xff]   ;;  %vm852_vm3 = vcmask 326656   ;;  %s3788_s15 = smov 88   ;;  %s3789_s28 = smov 96  }
  0x12   : > { %3462 = vmatmul.mubr.msk.bf16.vlgmr.msra.gmra.mxu0 %vm445_vm1, %v3698_v5  ;;  %v3703_v10 = vld [vmem:[%s381_s29 + $0x30] sm:$0xff]   ;;  %v3704_v11 = vld [vmem:[%s381_s29 + $0x38] sm:$0xff]   ;;  %v675_v19 = vld [vmem:[%s4734_s6 + $0xc] sm:$0xf]  ;;  %3478 = vmatpush3.bf16.msra.mxu1 %v878_v20  ;;  %s3685_s27 = smul.u32 48, %s4771_s18 }
  0x13   : > { %3465 = vmatprep.mubr.msk.bf16.mxu0 %vm445_vm1, %v3699_v6  ;;  %3500 = vmatpush3.bf16.msra.mxu0 %v1027_v13  ;;  %680 = vst.msk [vmem:[#allocation2 + $0xc] sm:$0xf] %vm676_vm2, %v675_v19  ;;  %v3708_v21 = vld [vmem:[%s4733_s5 + $0x1c] sm:$0xff]   ;;  %v3710_v25 = vld [vmem:[%s4733_s5 + $0x14] sm:$0xff]   ;;  %v3720_v32 = vld [vmem:[%s4733_s5 + $0x4c] ss:$0 sps:$4 sm:$0xff]  }
  0x14   : > { %3501 = vmatprep.subr.bf16.mxu0 %v3707_v17  ;;  %v3709_v22 = vld [vmem:[%s4733_s5] sm:$0xff]   ;;  %3479 = vmatprep.subr.bf16.mxu1 %v3708_v21  ;;  %v3930_v31 = vld [vmem:[%s4733_s5 + $0x38] ss:$0 sps:$4 sm:$0xff]   ;;  %v1445_v33 = vsel %vm470_vm0, %v3720_v32, 0  ;;  %v3952_v37 = vld [vmem:[%s4733_s5 + $0x74] ss:$0 sps:$4 sm:$0xff]   ;;  %s4649_s12 = scalar_lea.vmem %s4739_s11, %s3685_s27 }
  0x15   : > { %v3724_v34 = vld [vmem:[%s4733_s5 + $0x44] sm:$0xff]   ;;  %v3726_v35 = vld [vmem:[%s4733_s5 + $0x3c] sm:$0xff]  }
  0x16   : > { %3480 = vmatpush3.bf16.msra.mxu1 %v3708_v21  ;;  %v769_v23 = vld [vmem:[#allocation2] sm:$0xf]  ;;  %v770_v24 = vld [vmem:[#allocation2 + $0x4] sm:$0xf] }
  0x17   : > { %3502 = vmatpush3.bf16.msra.mxu0 %v3707_v17  ;;  %v3141_v26 = vcombine.low %v769_v23, %v770_v24  ;;  %v771_v27 = vld [vmem:[#allocation2 + $0x8] sm:$0xf]  ;;  %3481 = vmatprep.subr.bf16.mxu1 %v3710_v25  ;;  %v681_v36 = vld [vmem:[%s4734_s6] sm:$0xf]  ;;  %v682_v14 = vld [vmem:[%s4734_s6 + $0x4] sm:$0xf] }
  0x18   : > { %3503 = vmatprep.subr.bf16.mxu0 %v3709_v22  ;;  %v3122_v30 = vcombine.low %v770_v24, %v771_v27  ;;  %685 = vst.msk [vmem:[#allocation2 + $0x50] sm:$0xf] %vm676_vm2, %v681_v36  ;;  %v3959_v38 = vld [vmem:[%s4730_s2] ss:$0 sm:$0xff]  ;;  %686 = vst.msk [vmem:[#allocation2 + $0x54] sm:$0xf] %vm676_vm2, %v682_v14 }
  0x19   : > { %v3964_v40 = vld [vmem:[%s4731_s3] ss:$0 sm:$0xff]  ;;  %v683_v24 = vld [vmem:[%s4734_s6 + $0x8] sm:$0xf] }
  0x1a   : > { %3466 = vmatmul.mubr.msk.bf16.gmra.mxu0 %vm445_vm1, %v3700_v7  ;;  %v3921_v28 = vld [vmem:[#allocation2 + $0xc] sm:$0xf]  ;;  %3482 = vmatpush3.bf16.msra.mxu1 %v3710_v25  ;;  %v3970_v43 = vld [vmem:[%s4732_s4] ss:$0 sm:$0xff]  ;;  %687 = vst.msk [vmem:[#allocation2 + $0x58] sm:$0xf] %vm676_vm2, %v683_v24 }
  0x1b   : > { %3469 = vmatprep.mubr.msk.bf16.mxu0 %vm445_vm1, %v3701_v8  ;;  %3504 = vmatpush3.bf16.msra.mxu0 %v3709_v22  ;;  %v3142_v29 = vcombine.low %v771_v27, %v3921_v28 }
  0x1c   : > { %3483 = vmatprep.mubr.msk.bf16.mxu1 %vm852_vm3, %v3122_v30  ;;  %3678 = vmatprep.subr.msk.bf16.mxu1 %vm470_vm0, %v3930_v31 }
  0x1d   : > { %3679 = vmatprep.subr.msk.bf16.mxu0 %vm470_vm0, %v3720_v32 }
  0x22   : > { %3470 = vmatmul.mubr.msk.bf16.gmra.mxu0 %vm445_vm1, %v3702_v9 }
  0x23   : > { %3473 = vmatprep.mubr.msk.bf16.mxu0 %vm445_vm1, %v3703_v10 }
  0x2a   : > { %3474 = vmatmul.mubr.msk.bf16.gmra.mxu0 %vm445_vm1, %v3704_v11 }
  0x2b   : > { %3505 = vmatprep.mubr.msk.bf16.mxu0 %vm852_vm3, %v3141_v26 }
  0x32   : > { %3506 = vmatmul.mubr.msk.bf16.vlgmr.msra.gmra.mxu0 %vm852_vm3, %v3142_v29  ;;  %v1228_v29 = vsel %vm470_vm0, %v3930_v31, 0  ;;  %v3716_v31 = vld [vmem:[%s4733_s5 + $0x30] sm:$0xff]  }
  0x33   : > { %3544 = vmatpush3.bf16.msra.mxu0 %v1445_v33 }
  0x34   : > { %3545 = vmatprep.subr.bf16.mxu0 %v3724_v34 }
  0x37   : > { %3546 = vmatpush3.bf16.msra.mxu0 %v3724_v34 }
  0x38   : > { %3547 = vmatprep.subr.bf16.mxu0 %v3726_v35 }
  0x3b   : > { %3548 = vmatpush3.bf16.msra.mxu0 %v3726_v35 }
  0x3c   : > { %3681 = vmatprep.subr.msk.bf16.mxu0 %vm470_vm0, %v3952_v37 }
  0xd2   : > { %v3463_v39 = vpop.f32.mrf.mxu0 }
  0xd3   : > { %v580_v41 = vmul.f32 %v3463_v39, %v3959_v38 }
  0xd4   : > { %v508_v42 = vpop.f32.mrf.mxu0 }
  0xd5   : > { %v603_v44 = vadd.f32 %v3964_v40, %v580_v41  ;;  %v578_v45 = vmul.f32 %v3959_v38, %v508_v42  ;;  %v4032_v42 = vld [vmem:[#allocation2 + $0xc] sm:$0xf] }
  0xd6   : > { %v3464_v46 = vpop.f32.mrf.mxu0 }
  0xd7   : > { %v601_v47 = vadd.f32 %v3964_v40, %v578_v45  ;;  %v581_v48 = vmul.f32 %v3464_v46, %v3959_v38  ;;  %vm619_vm4 = vcmp.gt.f32.partialorder %v603_v44, 0.0  ;;  %v642_v49 = vmul.f32 %v3970_v43, %v603_v44 }
  0xd8   : > { %v511_v50 = vpop.f32.mrf.mxu0 }
  0xd9   : > { %v604_v51 = vadd.f32 %v3964_v40, %v581_v48  ;;  %v579_v52 = vmul.f32 %v3959_v38, %v511_v50  ;;  %v658_v53 = vsel %vm619_vm4, %v603_v44, %v642_v49  ;;  %vm617_vm5 = vcmp.gt.f32.partialorder %v601_v47, 0.0 }
  0xda   : > { %2942 = vrot.lane.b32.xlu0 %v658_v53, %s3788_s15  ;;  %v3337_v54 = vpack.c.bf16 %v658_v53, %v658_v53  ;;  %v3467_v55 = vpop.f32.mrf.mxu0  ;;  %v640_v56 = vmul.f32 %v3970_v43, %v601_v47 }
  0xdb   : > { %v602_v57 = vadd.f32 %v3964_v40, %v579_v52  ;;  %v584_v58 = vmul.f32 %v3467_v55, %v3959_v38  ;;  %vm620_vm6 = vcmp.gt.f32.partialorder %v604_v51, 0.0  ;;  %v643_v59 = vmul.f32 %v3970_v43, %v604_v51 }
  0xdc   : > { %755 = vst.msk [vmem:[#allocation2 + $0x18] sm:$0xf] %vm676_vm2, %v3337_v54  ;;  %v524_v60 = vpop.f32.mrf.mxu0  ;;  %v656_v61 = vsel %vm617_vm5, %v601_v47, %v640_v56 }
  0xdd   : > { %v607_v62 = vadd.f32 %v3964_v40, %v584_v58  ;;  %v582_v63 = vmul.f32 %v3959_v38, %v524_v60  ;;  %v3335_v0 = vpack.c.bf16 %v656_v61, %v656_v61  ;;  %v659_v1 = vsel %vm620_vm6, %v604_v51, %v643_v59 }
  0xde   : > { %2938 = vrot.lane.b32.xlu0 %v656_v61, %s3788_s15  ;;  %v3468_v2 = vpop.f32.mrf.mxu0  ;;  %v3338_v3 = vpack.c.bf16 %v659_v1, %v659_v1  ;;  %vm618_vm7 = vcmp.gt.f32.partialorder %v602_v57, 0.0  ;;  %v641_v4 = vmul.f32 %v3970_v43, %v602_v57 }
  0xdf   : > { %v605_v5 = vadd.f32 %v3964_v40, %v582_v63  ;;  %753 = vst.msk [vmem:[#allocation2 + $0x10] sm:$0xf] %vm676_vm2, %v3335_v0  ;;  %v585_v6 = vmul.f32 %v3468_v2, %v3959_v38  ;;  %vm623_vm8 = vcmp.gt.f32.partialorder %v607_v62, 0.0  ;;  %v646_v7 = vmul.f32 %v3970_v43, %v607_v62 }
  0xe0   : > { %v527_v8 = vpop.f32.mrf.mxu0  ;;  %756 = vst.msk [vmem:[#allocation2 + $0x1c] sm:$0xf] %vm676_vm2, %v3338_v3  ;;  %v657_v9 = vsel %vm618_vm7, %v602_v57, %v641_v4  ;;  %v4056_v57 = vpop.permute.xlu1 %2781  ;;  %v3723_v4 = vld [vmem:[%s4733_s5 + $0x28] sm:$0xff]  }
  0xe1   : > { %v608_v10 = vadd.f32 %v3964_v40, %v585_v6  ;;  %v583_v11 = vmul.f32 %v3959_v38, %v527_v8  ;;  %v3336_v12 = vpack.c.bf16 %v657_v9, %v657_v9  ;;  %v662_v13 = vsel %vm623_vm8, %v607_v62, %v646_v7 }
  0xe2   : > { %2944 = vrot.lane.b32.xlu0 %v659_v1, %s3788_s15  ;;  %v3471_v15 = vpop.f32.mrf.mxu0  ;;  %v3341_v16 = vpack.c.bf16 %v662_v13, %v662_v13  ;;  %vm621_vm9 = vcmp.gt.f32.partialorder %v605_v5, 0.0  ;;  %v644_v17 = vmul.f32 %v3970_v43, %v605_v5 }
  0xe3   : > { %v606_v18 = vadd.f32 %v3964_v40, %v583_v11  ;;  %754 = vst.msk [vmem:[#allocation2 + $0x14] sm:$0xf] %vm676_vm2, %v3336_v12  ;;  %vm624_vm10 = vcmp.gt.f32.partialorder %v608_v10, 0.0  ;;  %v647_v19 = vmul.f32 %v3970_v43, %v608_v10  ;;  %v588_v25 = vmul.f32 %v3471_v15, %v3959_v38  ;;  %v775_v39 = vld [vmem:[#allocation2 + $0x18] sm:$0xf] }
  0xe4   : > { %v540_v20 = vpop.f32.mrf.mxu0  ;;  %759 = vst.msk [vmem:[#allocation2 + $0x28] sm:$0xf] %vm676_vm2, %v3341_v16  ;;  %v4006_v21 = vsel %vm621_vm9, %v605_v5, %v644_v17 }
  0xe5   : > { %vm622_vm11 = vcmp.gt.f32.partialorder %v606_v18, 0.0  ;;  %v645_v22 = vmul.f32 %v3970_v43, %v606_v18  ;;  %v586_v23 = vmul.f32 %v3959_v38, %v540_v20  ;;  %v3339_v30 = vpack.c.bf16 %v4006_v21, %v4006_v21 }
  0xe6   : > { %2940 = vrot.lane.b32.xlu0 %v657_v9, %s3788_s15  ;;  %v3472_v26 = vpop.f32.mrf.mxu0  ;;  %v773_v27 = vld [vmem:[#allocation2 + $0x10] sm:$0xf]  ;;  %v4019_v32 = vsel %vm624_vm10, %v608_v10, %v647_v19  ;;  %v4047_v50 = vadd.f32 %v3964_v40, %v588_v25 }
  0xe7   : > { %v4022_v33 = vsel %vm622_vm11, %v606_v18, %v645_v22  ;;  %v609_v34 = vadd.f32 %v3964_v40, %v586_v23  ;;  %v589_v35 = vmul.f32 %v3472_v26, %v3959_v38  ;;  %v3123_v36 = vcombine.low %v3921_v28, %v773_v27  ;;  %v4027_v41 = vld [vmem:[#allocation2 + $0x1c] sm:$0xf]  ;;  %757 = vst.msk [vmem:[#allocation2 + $0x20] sm:$0xf] %vm676_vm2, %v3339_v30  ;;  %v4037_v46 = vld [vmem:[#allocation2 + $0x10] sm:$0xf] }
  0xe8   : > { %v3340_v44 = vpack.c.bf16 %v4022_v33, %v4022_v33  ;;  %v543_v45 = vpop.f32.mrf.mxu0  ;;  %v3342_v28 = vpack.c.bf16 %v4019_v32, %v4019_v32  ;;  %v3144_v53 = vcombine.low %v775_v39, %v4027_v41  ;;  %v2645_v63 = vmax.bf16 %v4037_v46, %v4032_v42  ;;  %v4088_v12 = vld [vmem:[#allocation2 + $0x10] sm:$0xf]  ;;  %v4092_v14 = vld [vmem:[#allocation2 + $0x1c] sm:$0xf]  ;;  %v4111_v30 = vld [vmem:[#allocation2 + $0x18] sm:$0xf] }
  0xe9   : > { %vm625_vm12 = vcmp.gt.f32.partialorder %v609_v34, 0.0  ;;  %v648_v47 = vmul.f32 %v3970_v43, %v609_v34  ;;  %v612_v48 = vadd.f32 %v3964_v40, %v589_v35  ;;  %v587_v49 = vmul.f32 %v3959_v38, %v543_v45  ;;  %3484 = vmatmul.mubr.msk.bf16.vlgmr.msra.gmra.mxu1 %vm852_vm3, %v3123_v36  ;;  %v4131_v45 = vld [vmem:[%s4733_s5 + $0x60] ss:$0 sps:$4 sm:$0xff]  }
  0xea   : > { %758 = vst.msk [vmem:[#allocation2 + $0x24] sm:$0xf] %vm676_vm2, %v3340_v44  ;;  %3522 = vmatpush3.bf16.msra.mxu1 %v1228_v29  ;;  %2950 = vrot.lane.b32.xlu0 %v662_v13, %s3788_s15  ;;  %v3475_v51 = vpop.f32.mrf.mxu0  ;;  %v774_v52 = vld [vmem:[#allocation2 + $0x14] sm:$0xf]  ;;  %760 = vst.msk [vmem:[#allocation2 + $0x2c] sm:$0xf] %vm676_vm2, %v3342_v28  ;;  %v650_v7 = vmul.f32 %v3970_v43, %v4047_v50 }
  0xeb   : > { %v4052_v54 = vsel %vm625_vm12, %v609_v34, %v648_v47  ;;  %vm628_vm13 = vcmp.gt.f32.partialorder %v612_v48, 0.0  ;;  %v651_v55 = vmul.f32 %v3970_v43, %v612_v48  ;;  %v610_v56 = vadd.f32 %v3964_v40, %v587_v49  ;;  %3523 = vmatprep.subr.bf16.mxu1 %v3716_v31  ;;  %v4058_v58 = vld [vmem:[#allocation2 + $0x14] sm:$0xf]  ;;  %v4090_v13 = vld [vmem:[#allocation2 + $0x18] sm:$0xf] }
  0xec   : > { %v3343_v59 = vpack.c.bf16 %v4052_v54, %v4052_v54  ;;  %v556_v60 = vpop.f32.mrf.mxu0  ;;  %v3124_v61 = vcombine.low %v774_v52, %v775_v39  ;;  %v3143_v62 = vcombine.low %v773_v27, %v774_v52  ;;  %v4068_v3 = vld [vmem:[#allocation2 + $0x14] sm:$0xf]  ;;  %v2661_v6 = vmax.bf16 %v2645_v63, %v4058_v58  ;;  %v779_v23 = vld [vmem:[#allocation2 + $0x28] sm:$0xf]  ;;  %v4109_v29 = vld [vmem:[#allocation2 + $0x18] sm:$0xf] }
  0xed   : > { %v4064_v0 = vsel %vm628_vm13, %v612_v48, %v651_v55  ;;  %vm626_vm14 = vcmp.gt.f32.partialorder %v610_v56, 0.0  ;;  %v649_v1 = vmul.f32 %v3970_v43, %v610_v56  ;;  %v590_v2 = vmul.f32 %v3959_v38, %v556_v60  ;;  %v4100_v19 = vld [vmem:[#allocation2 + $0x14] sm:$0xf] }
  0xee   : > { %761 = vst.msk [vmem:[#allocation2 + $0x30] sm:$0xf] %vm676_vm2, %v3343_v59  ;;  %v3346_v5 = vpack.c.bf16 %v4064_v0, %v4064_v0  ;;  %3487 = vmatprep.mubr.msk.bf16.mxu1 %vm852_vm3, %v3124_v61  ;;  %3509 = vmatprep.mubr.msk.bf16.mxu0 %vm852_vm3, %v3143_v62  ;;  %v592_v9 = vmul.f32 %v3475_v51, %v3959_v38  ;;  %v777_v11 = vld [vmem:[#allocation2 + $0x20] sm:$0xf]  ;;  %v2677_v17 = vunpack.c.l.bf16 %v2661_v6  ;;  %vm627_vm1 = vcmp.gt.f32.partialorder %v4047_v50, 0.0  ;;  %v3476_v49 = vpop.f32.mrf.mxu0 }
  0xef   : > { %v4081_v8 = vsel %vm626_vm14, %v610_v56, %v649_v1  ;;  %v613_v10 = vadd.f32 %v3964_v40, %v590_v2  ;;  %3510 = vmatmul.mubr.msk.bf16.gmra.mxu0 %vm852_vm3, %v3144_v53  ;;  %2946 = vrot.lane.b32.xlu0 %v4006_v21, %s3788_s15  ;;  %v3125_v16 = vcombine.low %v4027_v41, %v777_v11  ;;  %v4103_v21 = vpop.permute.xlu1 %2806  ;;  %v4122_v41 = vld [vmem:[#allocation2 + $0x1c] sm:$0xf]  ;;  %v4126_v44 = vld [vmem:[#allocation2 + $0x20] sm:$0xf] }
  0xf0   : > { %764 = vst.msk [vmem:[#allocation2 + $0x3c] sm:$0xf] %vm676_vm2, %v3346_v5  ;;  %v3344_v15 = vpack.c.bf16 %v4081_v8, %v4081_v8  ;;  %3524 = vmatpush3.bf16.msra.mxu1 %v3716_v31  ;;  %v2646_v18 = vmax.bf16 %v4068_v3, %v4088_v12  ;;  %v2784_v24 = vmul.f32 %v4056_v57, %v2677_v17  ;;  %v4141_v48 = vld [vmem:[#allocation2 + $0x20] sm:$0xf]  ;;  %v4149_v61 = vld [vmem:[#allocation2 + $0x1c] sm:$0xf] }
  0xf1   : > { %vm629_vm15 = vcmp.gt.f32.partialorder %v613_v10, 0.0  ;;  %v652_v20 = vmul.f32 %v3970_v43, %v613_v10  ;;  %v778_v22 = vld [vmem:[#allocation2 + $0x24] sm:$0xf]  ;;  %3525 = vmatprep.subr.bf16.mxu1 %v3723_v4  ;;  %3488 = vmatmul.mubr.msk.bf16.gmra.mxu1 %vm852_vm3, %v3125_v16  ;;  %v780_v27 = vld [vmem:[#allocation2 + $0x2c] sm:$0xf]  ;;  %v2648_v34 = vmax.bf16 %v4092_v14, %v4090_v13  ;;  %v615_v35 = vadd.f32 %v3964_v40, %v592_v9 }
  0xf2   : > { %762 = vst.msk [vmem:[#allocation2 + $0x34] sm:$0xf] %vm676_vm2, %v3344_v15  ;;  %v3126_v25 = vcombine.low %v778_v22, %v779_v23  ;;  %v3145_v26 = vcombine.low %v777_v11, %v778_v22  ;;  %v2662_v39 = vmax.bf16 %v2646_v18, %v4109_v29  ;;  %v2647_v31 = vmax.bf16 %v4111_v30, %v4100_v19  ;;  %v4144_v59 = vld [vmem:[#allocation2 + $0x24] sm:$0xf] }
  0xf3   : > { %v4117_v36 = vsel %vm629_vm15, %v613_v10, %v652_v20  ;;  %2952 = vrot.lane.b32.xlu0 %v4019_v32, %s3788_s15  ;;  %v2809_v47 = vadd.f32 %v4103_v21, %v2784_v24  ;;  %v666_v32 = vsel %vm627_vm1, %v4047_v50, %v650_v7  ;;  %v3146_v51 = vcombine.low %v779_v23, %v780_v27  ;;  %v4151_v62 = vld [vmem:[#allocation2 + $0x24] sm:$0xf]  ;;  %v4174_v20 = vld [vmem:[#allocation2 + $0x28] sm:$0xf] }
  0xf4   : > { %v3347_v28 = vpack.c.bf16 %v4117_v36, %v4117_v36  ;;  %3491 = vmatprep.mubr.msk.bf16.mxu1 %vm852_vm3, %v3126_v25  ;;  %3513 = vmatprep.mubr.msk.bf16.mxu0 %vm852_vm3, %v3145_v26  ;;  %v2678_v52 = vunpack.c.l.bf16 %v2662_v39  ;;  %v2663_v55 = vmax.bf16 %v2647_v31, %v4122_v41  ;;  %v3345_v56 = vpack.c.bf16 %v666_v32, %v666_v32  ;;  %v4171_v17 = vld [vmem:[#allocation2 + $0x24] sm:$0xf]  ;;  %v4180_v23 = vld [vmem:[#allocation2 + $0x28] sm:$0xf] }
  0xf5   : > { %v781_v53 = vld [vmem:[#allocation2 + $0x30] sm:$0xf]  ;;  %3526 = vmatpush3.bf16.msra.mxu1 %v3723_v4  ;;  %2841 = vrot.lane.b32.xlu1 %v2809_v47, %s3789_s28  ;;  %v2664_v50 = vmax.bf16 %v2648_v34, %v4126_v44  ;;  %v2649_v2 = vmax.bf16 %v4141_v48, %v4149_v61  ;;  %v4160_v4 = vld [vmem:[#allocation2 + $0x20] sm:$0xf]  ;;  %vm631_vm4 = vcmp.gt.f32.partialorder %v615_v35, 0.0  ;;  %v593_v5 = vmul.f32 %v3476_v49, %v3959_v38 }
  0xf6   : > { %765 = vst.msk [vmem:[#allocation2 + $0x40] sm:$0xf] %vm676_vm2, %v3347_v28  ;;  %v3127_v60 = vcombine.low %v780_v27, %v781_v53  ;;  %v2785_v63 = vmul.f32 %v4056_v57, %v2678_v52  ;;  %v2679_v1 = vunpack.c.l.bf16 %v2663_v55  ;;  %763 = vst.msk [vmem:[#allocation2 + $0x38] sm:$0xf] %vm676_vm2, %v3345_v56  ;;  %v2650_v6 = vmax.bf16 %v4144_v59, %v4160_v4  ;;  %v4196_v52 = vld [vmem:[#allocation2 + $0x2c] sm:$0xf] }
  0xf7   : > { %3514 = vmatmul.mubr.msk.bf16.gmra.mxu0 %vm852_vm3, %v3146_v51  ;;  %2948 = vrot.lane.b32.xlu0 %v4022_v33, %s3788_s15  ;;  %v654_v7 = vmul.f32 %v3970_v43, %v615_v35  ;;  %v559_v33 = vpop.f32.mrf.mxu0  ;;  %v2680_v15 = vunpack.c.l.bf16 %v2664_v50  ;;  %v2665_v16 = vmax.bf16 %v2649_v2, %v4151_v62  ;;  %v616_v25 = vadd.f32 %v3964_v40, %v593_v5  ;;  %v784_v27 = vld [vmem:[#allocation2 + $0x3c] sm:$0xf]  ;;  %v3728_v56 = vld [vmem:[#allocation2 + $0x8] sm:$0xff]  }
  0xf8   : > { %3680 = vmatprep.subr.msk.bf16.mxu1 %vm470_vm0, %v4131_v45  ;;  %v2810_v9 = vadd.f32 %v4103_v21, %v2785_v63  ;;  %v2786_v10 = vmul.f32 %v4056_v57, %v2679_v1  ;;  %v591_v26 = vmul.f32 %v3959_v38, %v559_v33  ;;  %v2651_v34 = vmax.bf16 %v4180_v23, %v4171_v17  ;;  %v4202_v50 = vld [vmem:[#allocation2 + $0x2c] sm:$0xf]  ;;  %v4208_v2 = vld [vmem:[#allocation2 + $0x28] sm:$0xf] }
  0xf9   : > { %v782_v11 = vld [vmem:[#allocation2 + $0x34] sm:$0xf]  ;;  %3492 = vmatmul.mubr.msk.bf16.gmra.mxu1 %vm852_vm3, %v3127_v60  ;;  %v4176_v22 = vsel %vm631_vm4, %v615_v35, %v654_v7  ;;  %v2787_v39 = vmul.f32 %v4056_v57, %v2680_v15  ;;  %v2681_v28 = vunpack.c.l.bf16 %v2665_v16  ;;  %v2666_v47 = vmax.bf16 %v2650_v6, %v4174_v20  ;;  %v4225_v33 = vld [vmem:[#allocation2 + $0x2c] sm:$0xf]  ;;  %v4234_v16 = vld [vmem:[#allocation2 + $0x30] sm:$0xf] }
  0xfa   : > { %v3147_v18 = vcombine.low %v781_v53, %v782_v11  ;;  %2843 = vrot.lane.b32.xlu1 %v2810_v9, %s3789_s28  ;;  %v3349_v24 = vpack.c.bf16 %v4176_v22, %v4176_v22  ;;  %v2811_v35 = vadd.f32 %v4103_v21, %v2786_v10  ;;  %v614_v53 = vadd.f32 %v3964_v40, %v591_v26  ;;  %v4227_v9 = vld [vmem:[#allocation2 + $0x30] sm:$0xf] }
  0xfb   : > { %2958 = vrot.lane.b32.xlu0 %v666_v32, %s3788_s15  ;;  %v3189_v55 = vcombine.low %v4032_v42, %v4088_v12  ;;  %v2667_v60 = vmax.bf16 %v2651_v34, %v4196_v52  ;;  %vm632_vm5 = vcmp.gt.f32.partialorder %v616_v25, 0.0  ;;  %v2812_v63 = vadd.f32 %v4103_v21, %v2787_v39  ;;  %v4213_v42 = vld [vmem:[#allocation2 + $0x30] sm:$0xf] }
  0xfc   : > { %3517 = vmatprep.mubr.msk.bf16.mxu0 %vm852_vm3, %v3147_v18  ;;  %767 = vst.msk [vmem:[#allocation2 + $0x48] sm:$0xf] %vm676_vm2, %v3349_v24  ;;  %v2682_v1 = vunpack.c.l.bf16 %v2666_v47  ;;  %v655_v40 = vmul.f32 %v3970_v43, %v616_v25  ;;  %v2652_v12 = vmax.bf16 %v4202_v50, %v4208_v2  ;;  %v1662_v6 = vsel %vm470_vm0, %v4131_v45, 0  ;;  %v4236_v18 = vld [vmem:[#allocation2 + $0x34] sm:$0xf]  ;;  %v3743_v39 = vld [vmem:[%s4733_s5 + $0x6c] sm:$0xff]  }
  0xfd   : > { %v790_v31 = vld [vmem:[#allocation2 + $0x40] sm:$0xf]  ;;  %v783_v32 = vld [vmem:[#allocation2 + $0x38] sm:$0xf]  ;;  %v2683_v7 = vunpack.c.l.bf16 %v2667_v60  ;;  %vm630_vm6 = vcmp.gt.f32.partialorder %v614_v53, 0.0  ;;  %v653_v45 = vmul.f32 %v3970_v43, %v614_v53  ;;  %v2653_v26 = vmax.bf16 %v4227_v9, %v4225_v33 }
  0xfe   : > { %v3129_v49 = vcombine.low %v784_v27, %v790_v31  ;;  %2845 = vrot.lane.b32.xlu1 %v2811_v35, %s3789_s28  ;;  %v3128_v38 = vcombine.low %v782_v11, %v783_v32  ;;  %v3148_v51 = vcombine.low %v783_v32, %v784_v27  ;;  %v4220_v5 = vsel %vm632_vm5, %v616_v25, %v655_v40  ;;  %v4239_v24 = vld [vmem:[#allocation2 + $0x34] sm:$0xf]  ;;  %v3735_v27 = vld [vmem:[%s4733_s5 + $0x58] sm:$0xff]   ;;  %v3734_v40 = vld [vmem:[#allocation2 + $0x28] sm:$0xff]  }
  0xff   : > { %2954 = vrot.lane.b32.xlu0 %v4052_v54, %s3788_s15  ;;  %v2788_v54 = vmul.f32 %v4056_v57, %v2681_v28  ;;  %v3350_v10 = vpack.c.bf16 %v4220_v5, %v4220_v5  ;;  %v2789_v11 = vmul.f32 %v4056_v57, %v2682_v1  ;;  %v2668_v15 = vmax.bf16 %v2652_v12, %v4213_v42  ;;  %v3730_v35 = vld [vmem:[#allocation2 + $0x10] sm:$0xff]   ;;  %v3731_v28 = vld [vmem:[#allocation2 + $0x18] sm:$0xff]   ;;  %v3745_v12 = vld [vmem:[%s4733_s5 + $0x64] sm:$0xff]  }
 0x100   : > { %3495 = vmatprep.mubr.msk.bf16.mxu1 %vm852_vm3, %v3128_v38  ;;  %3518 = vmatmul.mubr.msk.bf16.gmra.mxu0 %vm852_vm3, %v3148_v51  ;;  %v3190_v25 = vcombine.low %v4100_v19, %v4090_v13  ;;  %v4252_v43 = vsel %vm630_vm6, %v614_v53, %v653_v45  ;;  %v3191_v34 = vcombine.low %v4149_v61, %v4160_v4  ;;  %v4271_v32 = vld [vmem:[#allocation2 + $0x34] sm:$0xf]  ;;  %v4283_v38 = vld [vmem:[#allocation2 + $0x38] sm:$0xf]  ;;  %v4292_v1 = vld [vmem:[#allocation2 + $0x3c] sm:$0xf] }
 0x101   : > { %3549 = vmatprep.mubr.msk.bf16.mxu0 %vm852_vm3, %v3189_v55  ;;  %3496 = vmatmul.mubr.msk.bf16.gmra.mxu1 %vm852_vm3, %v3129_v49  ;;  %768 = vst.msk [vmem:[#allocation2 + $0x4c] sm:$0xf] %vm676_vm2, %v3350_v10  ;;  %v2654_v13 = vmax.bf16 %v4236_v18, %v4234_v16  ;;  %v3348_v19 = vpack.c.bf16 %v4252_v43, %v4252_v43  ;;  %v2684_v4 = vunpack.c.l.bf16 %v2668_v15  ;;  %v4278_v49 = vld [vmem:[#allocation2 + $0x38] sm:$0xf] }
 0x102   : > { %2847 = vrot.lane.b32.xlu1 %v2812_v63, %s3789_s28  ;;  %3527 = vmatprep.mubr.msk.bf16.mxu1 %vm852_vm3, %v3728_v56  ;;  %v2814_v31 = vadd.f32 %v4103_v21, %v2789_v11  ;;  %v2790_v61 = vmul.f32 %v4056_v57, %v2683_v7  ;;  %v2669_v47 = vmax.bf16 %v2653_v26, %v4239_v24  ;;  %v3733_v63 = vld [vmem:[#allocation2 + $0x20] sm:$0xff]   ;;  %v1354_v7 = vld [vmem:[#allocation2 + $0x38] sm:$0xf] }
 0x103   : > { %2960 = vrot.lane.b32.xlu0 %v4064_v0, %s3788_s15  ;;  %v2813_v0 = vadd.f32 %v4103_v21, %v2788_v54  ;;  %766 = vst.msk [vmem:[#allocation2 + $0x44] sm:$0xf] %vm676_vm2, %v3348_v19  ;;  %v2670_v51 = vmax.bf16 %v2654_v13, %v4278_v49  ;;  %v2791_v55 = vmul.f32 %v4056_v57, %v2684_v4  ;;  %v4290_v54 = vld [vmem:[#allocation2 + $0x3c] sm:$0xf]  ;;  %v4312_v45 = vld [vmem:[#allocation2 + $0x48] sm:$0xf] }
 0x104   : > { %v2815_v53 = vadd.f32 %v4103_v21, %v2790_v61  ;;  %v2685_v56 = vunpack.c.l.bf16 %v2669_v47  ;;  %v2655_v60 = vmax.bf16 %v4283_v38, %v4271_v32  ;;  %v684_v13 = vld [vmem:[%s4734_s6 + $0xc] sm:$0xf]  ;;  %v3194_v47 = vcombine.low %v4271_v32, %v1354_v7 }
 0x105   : > { %v2686_v10 = vunpack.c.l.bf16 %v2670_v51  ;;  %688 = vst.msk [vmem:[#allocation2 + $0x5c] sm:$0xf] %vm676_vm2, %v684_v13  ;;  %v1790_v13 = vld [vmem:[#allocation2 + $0x48] sm:$0xf] }
 0x106   : > { %2849 = vrot.lane.b32.xlu1 %v2813_v0, %s3789_s28  ;;  %v4304_v0 = vld [vmem:[#allocation2 + $0x40] sm:$0xf]  ;;  %v2671_v11 = vmax.bf16 %v2655_v60, %v4292_v1  ;;  %v1358_v60 = vld [vmem:[#allocation2 + $0x48] sm:$0xf] }
 0x107   : > { %2956 = vrot.lane.b32.xlu0 %v4081_v8, %s3788_s15  ;;  %v1879_v8 = vsel %vm470_vm0, %v3952_v37, 0  ;;  %v3742_v37 = vld [vmem:[%s4733_s5 + $0x50] sm:$0xff]   ;;  %v2793_v26 = vmul.f32 %v4056_v57, %v2686_v10 }
 0x108   : > { %3550 = vmatmul.mubr.msk.bf16.vlgmr.msra.gmra.mxu0 %vm852_vm3, %v3190_v25  ;;  %v4326_v25 = vld [vmem:[#allocation2 + $0x4c] sm:$0xf]  ;;  %v4373_v10 = vld [vmem:[#allocation2 + $0x50] sm:$0xf] }
 0x109   : > { %3553 = vmatprep.mubr.msk.bf16.mxu0 %vm852_vm3, %v3191_v34  ;;  %3528 = vmatmul.mubr.msk.bf16.vlgmr.msra.gmra.mxu1 %vm852_vm3, %v3730_v35  ;;  %v4345_v61 = vld [vmem:[#allocation2 + $0x4c] sm:$0xf]  ;;  %v2818_v51 = vadd.f32 %v4103_v21, %v2793_v26  ;;  %v3237_v26 = vcombine.low %v4058_v58, %v4109_v29  ;;  %v3238_v29 = vcombine.low %v4122_v41, %v4126_v44  ;;  %v3750_v44 = vld [vmem:[%s4733_s5 + $0x94] sm:$0xff]  }
 0x10a   : > { %2851 = vrot.lane.b32.xlu1 %v2814_v31, %s3789_s28  ;;  %3566 = vmatpush3.bf16.msra.mxu1 %v1662_v6  ;;  %v3193_v6 = vcombine.low %v4225_v33, %v4234_v16  ;;  %v4310_v15 = vld [vmem:[#allocation2 + $0x44] sm:$0xf]  ;;  %v4322_v16 = vld [vmem:[%s4733_s5 + $0x88] ss:$0 sps:$4 sm:$0xff]   ;;  %v2687_v31 = vunpack.c.l.bf16 %v2671_v11  ;;  %v2660_v32 = vmax.bf16 %v4345_v61, %v1358_v60 }
 0x10b   : > { %3531 = vmatprep.mubr.msk.bf16.mxu1 %vm852_vm3, %v3731_v28  ;;  %2966 = vrot.lane.b32.xlu0 %v4176_v22, %s3788_s15  ;;  %v3192_v22 = vcombine.low %v4171_v17, %v4208_v2  ;;  %v2816_v17 = vadd.f32 %v4103_v21, %v2791_v55  ;;  %v2792_v2 = vmul.f32 %v4056_v57, %v2685_v56  ;;  %v4347_v4 = vld [vmem:[#allocation2 + $0x44] sm:$0xf]  ;;  %v3738_v55 = vld [vmem:[#allocation2 + $0x30] sm:$0xff]  }
 0x10c   : > { %3567 = vmatprep.subr.bf16.mxu1 %v3735_v27  ;;  %3588 = vmatpush3.bf16.msra.mxu0 %v1879_v8  ;;  %v2659_v33 = vmax.bf16 %v4312_v45, %v4310_v15  ;;  %v1356_v8 = vld [vmem:[#allocation2 + $0x40] sm:$0xf]  ;;  %v2676_v11 = vmax.bf16 %v2660_v32, %v4373_v10 }
 0x10d   : > { %3589 = vmatprep.subr.bf16.mxu0 %v3743_v39  ;;  %v2817_v19 = vadd.f32 %v4103_v21, %v2792_v2 }
 0x10e   : > { %2853 = vrot.lane.b32.xlu1 %v2815_v53, %s3789_s28  ;;  %3568 = vmatpush3.bf16.msra.mxu1 %v3735_v27  ;;  %v4331_v27 = vld [vmem:[#allocation2 + $0x40] sm:$0xf]  ;;  %v2675_v34 = vmax.bf16 %v2659_v33, %v4326_v25  ;;  %v3196_v33 = vcombine.low %v4310_v15, %v1358_v60  ;;  %v3214_v15 = vcombine.low %v4111_v30, %v4092_v14  ;;  %v3762_v60 = vld [vmem:[#allocation2 + $0x38] sm:$0xff]  }
 0x10f   : > { %2962 = vrot.lane.b32.xlu0 %v4117_v36, %s3788_s15  ;;  %3569 = vmatprep.subr.bf16.mxu1 %v3742_v37  ;;  %v2656_v36 = vmax.bf16 %v4290_v54, %v1354_v7  ;;  %v4367_v7 = vld [vmem:[#allocation2 + $0x44] sm:$0xf]  ;;  %v3215_v14 = vcombine.low %v4141_v48, %v4144_v59  ;;  %v3240_v48 = vcombine.low %v4196_v52, %v4213_v42  ;;  %v3753_v52 = vld [vmem:[%s4733_s5 + $0x8c] sm:$0xff]  }
 0x110   : > { %3554 = vmatmul.mubr.msk.bf16.gmra.mxu0 %vm852_vm3, %v3192_v22  ;;  %v2691_v28 = vunpack.c.l.bf16 %v2675_v34  ;;  %v3739_v22 = vld [vmem:[#allocation2 + $0x38] sm:$0xff]   ;;  %v3744_v34 = vld [vmem:[#allocation2 + $0x40] sm:$0xff]   ;;  %v3241_v59 = vcombine.low %v4239_v24, %v4278_v49  ;;  %v3218_v42 = vcombine.low %v4283_v38, %v4290_v54  ;;  %v3220_v49 = vcombine.low %v4312_v45, %v4345_v61  ;;  %v3758_v45 = vld [vmem:[#allocation2 + $0x28] sm:$0xff]  }
 0x111   : > { %3557 = vmatprep.mubr.msk.bf16.mxu0 %vm852_vm3, %v3193_v6  ;;  %3532 = vmatmul.mubr.msk.bf16.gmra.mxu1 %vm852_vm3, %v3733_v63  ;;  %v2672_v35 = vmax.bf16 %v2656_v36, %v4304_v0  ;;  %v2658_v36 = vmax.bf16 %v4367_v7, %v1356_v8  ;;  %v3751_v24 = vld [vmem:[#allocation2 + $0x1c] sm:$0xff]   ;;  %v3754_v54 = vld [vmem:[#allocation2 + $0x24] sm:$0xff]  }
 0x112   : > { %2855 = vrot.lane.b32.xlu1 %v2816_v17, %s3789_s28  ;;  %3535 = vmatprep.mubr.msk.bf16.mxu1 %vm852_vm3, %v3734_v40  ;;  %v2798_v56 = vmul.f32 %v4056_v57, %v2691_v28  ;;  %v2794_v40 = vmul.f32 %v4056_v57, %v2687_v31  ;;  %v3239_v28 = vcombine.low %v4151_v62, %v4174_v20  ;;  %v3752_v38 = vld [vmem:[#allocation2 + $0x18] sm:$0xff]   ;;  %v3768_v61 = vld [vmem:[%s4733_s5 + $0xa0] sm:$0xff]  }
 0x113   : > { %2968 = vrot.lane.b32.xlu0 %v4220_v5, %s3788_s15  ;;  %3590 = vmatpush3.bf16.msra.mxu0 %v3743_v39  ;;  %v4342_v5 = vld [vmem:[%s4733_s5 + $0x9c] ss:$0 sps:$4 sm:$0xff]   ;;  %v2688_v63 = vunpack.c.l.bf16 %v2672_v35  ;;  %v3213_v35 = vcombine.low %v4037_v46, %v4068_v3  ;;  %v3216_v20 = vcombine.low %v4180_v23, %v4202_v50  ;;  %v3242_v23 = vcombine.low %v4292_v1, %v4304_v0  ;;  %v3755_v1 = vld [vmem:[#allocation2 + $0x2c] sm:$0xff]   ;;  %v3757_v0 = vld [vmem:[#allocation2 + $0x20] sm:$0xff]  }
 0x114   : > { %3570 = vmatpush3.bf16.msra.mxu1 %v3742_v37  ;;  %3591 = vmatprep.subr.bf16.mxu0 %v3745_v12  ;;  %v1355_v39 = vld [vmem:[#allocation2 + $0x3c] sm:$0xf]  ;;  %v2819_v17 = vadd.f32 %v4103_v21, %v2794_v40  ;;  %v2313_v30 = vsel %vm470_vm0, %v4342_v5, 0  ;;  %v3243_v50 = vcombine.low %v4347_v4, %v1790_v13  ;;  %v3765_v40 = vld [vmem:[#allocation2 + $0x4c] sm:$0xff]  }
 0x115   : > { %3682 = vmatprep.subr.msk.bf16.mxu1 %vm470_vm0, %v4322_v16  ;;  %v2657_v37 = vmax.bf16 %v4331_v27, %v1355_v39  ;;  %v3195_v53 = vcombine.low %v1355_v39, %v1356_v8  ;;  %v2692_v39 = vunpack.c.l.bf16 %v2676_v11  ;;  %v2674_v8 = vmax.bf16 %v2658_v36, %v1790_v13  ;;  %v3772_v36 = vld [vmem:[#allocation2 + $0x28] sm:$0xff]   ;;  %v3774_v13 = vld [vmem:[#allocation2 + $0x38] sm:$0xff]  }
 0x116   : > { %2857 = vrot.lane.b32.xlu1 %v2817_v19, %s3789_s28 }
 0x117   : > { %2964 = vrot.lane.b32.xlu0 %v4252_v43, %s3788_s15  ;;  %3592 = vmatpush3.bf16.msra.mxu0 %v3745_v12  ;;  %v2673_v6 = vmax.bf16 %v2657_v37, %v4347_v4  ;;  %v2823_v43 = vadd.f32 %v4103_v21, %v2798_v56  ;;  %v2795_v12 = vmul.f32 %v4056_v57, %v2688_v63  ;;  %v2690_v3 = vunpack.c.l.bf16 %v2674_v8  ;;  %v3747_v37 = vld [vmem:[%s4733_s5 + $0x80] sm:$0xff]   ;;  %v3759_v4 = vld [vmem:[#allocation2 + $0x34] sm:$0xff]  }
 0x118   : > { %3558 = vmatmul.mubr.msk.bf16.gmra.mxu0 %vm852_vm3, %v3194_v47  ;;  %3683 = vmatprep.subr.msk.bf16.mxu0 %vm470_vm0, %v4342_v5  ;;  %v2799_v46 = vmul.f32 %v4056_v57, %v2692_v39  ;;  %v2096_v47 = vsel %vm470_vm0, %v4322_v16, 0  ;;  %v3756_v16 = vld [vmem:[%s4733_s5 + $0xb0] ss:$0 sps:$4 sm:$0xff]  }
 0x119   : > { %3561 = vmatprep.mubr.msk.bf16.mxu0 %vm852_vm3, %v3195_v53  ;;  %3536 = vmatmul.mubr.msk.bf16.gmra.mxu1 %vm852_vm3, %v3738_v55  ;;  %v2689_v2 = vunpack.c.l.bf16 %v2673_v6  ;;  %v2820_v19 = vadd.f32 %v4103_v21, %v2795_v12  ;;  %v2797_v41 = vmul.f32 %v4056_v57, %v2690_v3  ;;  %v3760_v53 = vld [vmem:[#allocation2 + $0x3c] sm:$0xff]   ;;  %v3761_v56 = vld [vmem:[#allocation2 + $0x30] sm:$0xff]  }
 0x11a   : > { %2859 = vrot.lane.b32.xlu1 %v2818_v51, %s3789_s28  ;;  %3539 = vmatprep.mubr.msk.bf16.mxu1 %vm852_vm3, %v3739_v22  ;;  %v2824_v51 = vadd.f32 %v4103_v21, %v2799_v46  ;;  %v3764_v22 = vld [vmem:[#allocation2 + $0x44] sm:$0xff]   ;;  %v3771_v12 = vld [vmem:[#allocation2 + $0x54] sm:$0xff]  }
 0x11b   : > { %2869 = vrot.lane.b32.xlu0 %v2823_v43, %s3789_s28  ;;  %v2796_v31 = vmul.f32 %v4056_v57, %v2689_v2  ;;  %v3749_v57 = vld [vmem:[%s4733_s5 + $0x78] sm:$0xff]   ;;  %v2822_v62 = vadd.f32 %v4103_v21, %v2797_v41  ;;  %v3766_v6 = vld [vmem:[#allocation2 + $0x40] sm:$0xff]   ;;  %v3767_v43 = vld [vmem:[#allocation2 + $0x48] sm:$0xff]  }
 0x11c   : > { %v3776_v46 = vld [vmem:[#allocation2 + $0x48] sm:$0xff]  }
 0x11d   : > { %v2821_v58 = vadd.f32 %v4103_v21, %v2796_v31  ;;  %v3217_v21 = vcombine.low %v4227_v9, %v4236_v18  ;;  %v3219_v9 = vcombine.low %v4331_v27, %v4367_v7  ;;  %v3244_v18 = vcombine.low %v4326_v25, %v4373_v10  ;;  %v3763_v25 = vld [vmem:[%s4733_s5 + $0xa8] sm:$0xff]   ;;  %v3769_v10 = vld [vmem:[#allocation2 + $0x50] sm:$0xff]   ;;  %v3775_v31 = vld [vmem:[#allocation2 + $0x40] sm:$0xff]  }
 0x11e   : > { %2861 = vrot.lane.b32.xlu1 %v2819_v17, %s3789_s28  ;;  %v2530_v27 = vsel %vm470_vm0, %v3756_v16, 0  ;;  %v3770_v17 = vld [vmem:[#allocation2 + $0x20] sm:$0xff]  }
 0x120   : > { %3562 = vmatmul.mubr.msk.bf16.gmra.mxu0 %vm852_vm3, %v3196_v33 }
 0x121   : > { %3593 = vmatprep.mubr.msk.bf16.mxu0 %vm852_vm3, %v3237_v26  ;;  %3540 = vmatmul.mubr.msk.bf16.gmra.mxu1 %vm852_vm3, %v3744_v34  ;;  %v3773_v26 = vld [vmem:[#allocation2 + $0x30] sm:$0xff]  }
 0x122   : > { %2863 = vrot.lane.b32.xlu1 %v2820_v19, %s3789_s28  ;;  %3571 = vmatprep.mubr.msk.bf16.mxu1 %vm852_vm3, %v3213_v35 }
 0x126   : > { %2865 = vrot.lane.b32.xlu1 %v2821_v58, %s3789_s28  ;;  %v3777_v58 = vld [vmem:[#allocation2 + $0x50] sm:$0xff]  }
 0x128   : > { %3594 = vmatmul.mubr.msk.bf16.vlgmr.msra.gmra.mxu0 %vm852_vm3, %v3238_v29 }
 0x129   : > { %3597 = vmatprep.mubr.msk.bf16.mxu0 %vm852_vm3, %v3239_v28  ;;  %3572 = vmatmul.mubr.msk.bf16.vlgmr.msra.gmra.mxu1 %vm852_vm3, %v3214_v15  ;;  %v3778_v28 = vld [vmem:[#allocation2 + $0x58] sm:$0xff]  }
 0x12a   : > { %2871 = vrot.lane.b32.xlu1 %v2824_v51, %s3789_s28  ;;  %3610 = vmatpush3.bf16.msra.mxu1 %v2096_v47 }
 0x12b   : > { %3575 = vmatprep.mubr.msk.bf16.mxu1 %vm852_vm3, %v3215_v14  ;;  %3611 = vmatprep.subr.bf16.mxu1 %v3747_v37 }
 0x12c   : > { %3632 = vmatpush3.bf16.msra.mxu0 %v2313_v30 }
 0x12d   : > { %3633 = vmatprep.subr.bf16.mxu0 %v3750_v44 }
 0x12e   : > { %2867 = vrot.lane.b32.xlu1 %v2822_v62, %s3789_s28  ;;  %3612 = vmatpush3.bf16.msra.mxu1 %v3747_v37 }
 0x12f   : > { %3613 = vmatprep.subr.bf16.mxu1 %v3749_v57 }
 0x130   : > { %3598 = vmatmul.mubr.msk.bf16.gmra.mxu0 %vm852_vm3, %v3240_v48 }
 0x131   : > { %3601 = vmatprep.mubr.msk.bf16.mxu0 %vm852_vm3, %v3241_v59  ;;  %3576 = vmatmul.mubr.msk.bf16.gmra.mxu1 %vm852_vm3, %v3216_v20 }
 0x132   : > { %3579 = vmatprep.mubr.msk.bf16.mxu1 %vm852_vm3, %v3217_v21  ;;  %3614 = vmatpush3.bf16.msra.mxu1 %v3749_v57 }
 0x133   : > { %3634 = vmatpush3.bf16.msra.mxu0 %v3750_v44  ;;  %3684 = vmatprep.subr.msk.bf16.mxu1 %vm470_vm0, %v3756_v16 }
 0x134   : > { %3635 = vmatprep.subr.bf16.mxu0 %v3753_v52 }
 0x137   : > { %3636 = vmatpush3.bf16.msra.mxu0 %v3753_v52  ;;  %v3507_v52 = vpop.f32.mrf.mxu0 }
 0x138   : > { %3602 = vmatmul.mubr.msk.bf16.gmra.mxu0 %vm852_vm3, %v3242_v23 }
 0x139   : > { %3605 = vmatprep.mubr.msk.bf16.mxu0 %vm852_vm3, %v3243_v50  ;;  %3580 = vmatmul.mubr.msk.bf16.gmra.mxu1 %vm852_vm3, %v3218_v42  ;;  %v1063_v50 = vpop.f32.mrf.mxu0 }
 0x13a   : > { %3583 = vmatprep.mubr.msk.bf16.mxu1 %vm852_vm3, %v3219_v9 }
 0x13b   : > { %v3508_v9 = vpop.f32.mrf.mxu0 }
 0x140   : > { %3606 = vmatmul.mubr.msk.bf16.gmra.mxu0 %vm852_vm3, %v3244_v18 }
 0x141   : > { %3637 = vmatprep.mubr.msk.bf16.mxu0 %vm852_vm3, %v3751_v24  ;;  %3584 = vmatmul.mubr.msk.bf16.gmra.mxu1 %vm852_vm3, %v3220_v49  ;;  %v1066_v49 = vpop.f32.mrf.mxu0 }
 0x142   : > { %3615 = vmatprep.mubr.msk.bf16.mxu1 %vm852_vm3, %v3752_v38 }
 0x148   : > { %3638 = vmatmul.mubr.msk.bf16.vlgmr.msra.gmra.mxu0 %vm852_vm3, %v3754_v54 }
 0x149   : > { %3641 = vmatprep.mubr.msk.bf16.mxu0 %vm852_vm3, %v3755_v1  ;;  %3616 = vmatmul.mubr.msk.bf16.vlgmr.msra.gmra.mxu1 %vm852_vm3, %v3757_v0 }
 0x14a   : > { %3654 = vmatpush3.bf16.msra.mxu1 %v2530_v27  ;;  %3619 = vmatprep.mubr.msk.bf16.mxu1 %vm852_vm3, %v3758_v45 }
 0x14b   : > { %3655 = vmatprep.subr.bf16.mxu1 %v3763_v25 }
 0x14c   : > { %v4470_v5 = vpop.permute.xlu0 %2942 }
 0x14d   : > { %4740 = vst [vmem:[#allocation3_spill] sm:$0xff] %v4470_v5 }
 0x14e   : > { %3656 = vmatpush3.bf16.msra.mxu1 %v3763_v25 }
 0x14f   : > { %3657 = vmatprep.subr.bf16.mxu1 %v3768_v61 }
 0x150   : > { %v4475_v55 = vpop.permute.xlu0 %2938  ;;  %3642 = vmatmul.mubr.msk.bf16.gmra.mxu0 %vm852_vm3, %v3759_v4 }
 0x151   : > { %3645 = vmatprep.mubr.msk.bf16.mxu0 %vm852_vm3, %v3760_v53  ;;  %3620 = vmatmul.mubr.msk.bf16.gmra.mxu1 %vm852_vm3, %v3761_v56 }
 0x152   : > { %3623 = vmatprep.mubr.msk.bf16.mxu1 %vm852_vm3, %v3762_v60  ;;  %3658 = vmatpush3.bf16.msra.mxu1 %v3768_v61 }
 0x154   : > { %v4481_v63 = vpop.permute.xlu0 %2944 }
 0x155   : > { %4741 = vst [vmem:[#allocation4_spill] sm:$0xff] %v4481_v63 }
 0x158   : > { %v4483_v32 = vpop.permute.xlu0 %2940  ;;  %3646 = vmatmul.mubr.msk.bf16.gmra.mxu0 %vm852_vm3, %v3764_v22 }
 0x159   : > { %4742 = vst [vmem:[#allocation5_spill] sm:$0xff] %v4483_v32  ;;  %3649 = vmatprep.mubr.msk.bf16.mxu0 %vm852_vm3, %v3765_v40  ;;  %3624 = vmatmul.mubr.msk.bf16.gmra.mxu1 %vm852_vm3, %v3766_v6 }
 0x15a   : > { %3627 = vmatprep.mubr.msk.bf16.mxu1 %vm852_vm3, %v3767_v43 }
 0x15c   : > { %v4489_v7 = vpop.permute.xlu0 %2950 }
 0x15d   : > { %4743 = vst [vmem:[#allocation6_spill] sm:$0xff] %v4489_v7 }
 0x160   : > { %3650 = vmatmul.mubr.msk.bf16.gmra.mxu0 %vm852_vm3, %v3771_v12 }
 0x161   : > { %3628 = vmatmul.mubr.msk.bf16.gmra.mxu1 %vm852_vm3, %v3769_v10  ;;  %v4493_v2 = vpop.permute.xlu0 %2946 }
 0x162   : > { %4744 = vst [vmem:[#allocation7_spill] sm:$0xff] %v4493_v2  ;;  %3659 = vmatprep.mubr.msk.bf16.mxu1 %vm852_vm3, %v3770_v17 }
 0x165   : > { %v4496_v33 = vpop.permute.xlu0 %2952 }
 0x166   : > { %4745 = vst [vmem:[#allocation8_spill] sm:$0xff] %v4496_v33 }
 0x167   : > { %v2842_v11 = vpop.permute.xlu1 %2841 }
 0x168   : > { %2889 = vxpose.xlu1.b32.start [1/16] (narrow) %v2842_v11, 8 }
 0x169   : > { %3660 = vmatmul.mubr.msk.bf16.vlgmr.msra.gmra.mxu1 %vm852_vm3, %v3772_v36  ;;  %v4500_v35 = vpop.permute.xlu0 %2948 }
 0x16a   : > { %3663 = vmatprep.mubr.msk.bf16.mxu1 %vm852_vm3, %v3773_v26  ;;  %4746 = vst [vmem:[#allocation9_spill] sm:$0xff] %v4500_v35 }
 0x16c   : > { %v2844_v34 = vpop.permute.xlu1 %2843 }
 0x16d   : > { %2890 = vxpose.xlu1.b32.cont [2/16] (narrow) %v2844_v34, 8  ;;  %v4504_v39 = vpop.permute.xlu0 %2958 }
 0x16e   : > { %4747 = vst [vmem:[#allocation10_spill] sm:$0xff] %v4504_v39 }
 0x170   : > { %v2846_v19 = vpop.permute.xlu1 %2845 }
 0x171   : > { %2891 = vxpose.xlu1.b32.cont [3/16] (narrow) %v2846_v19, 8  ;;  %3664 = vmatmul.mubr.msk.bf16.gmra.mxu1 %vm852_vm3, %v3774_v13  ;;  %v4507_v29 = vpop.permute.xlu0 %2954 }
 0x172   : > { %3667 = vmatprep.mubr.msk.bf16.mxu1 %vm852_vm3, %v3775_v31  ;;  %4748 = vst [vmem:[#allocation11_spill] sm:$0xff] %v4507_v29 }
 0x174   : > { %v2848_v8 = vpop.permute.xlu1 %2847 }
 0x175   : > { %2892 = vxpose.xlu1.b32.cont [4/16] (narrow) %v2848_v8, 8  ;;  %v4510_v47 = vpop.permute.xlu0 %2960 }
 0x176   : > { %4749 = vst [vmem:[#allocation12_spill] sm:$0xff] %v4510_v47 }
 0x178   : > { %v2850_v3 = vpop.permute.xlu1 %2849 }
 0x179   : > { %2893 = vxpose.xlu1.b32.cont [5/16] (narrow) %v2850_v3, 8  ;;  %3668 = vmatmul.mubr.msk.bf16.gmra.mxu1 %vm852_vm3, %v3776_v46  ;;  %v4513_v41 = vpop.permute.xlu0 %2956 }
 0x17a   : > { %3671 = vmatprep.mubr.msk.bf16.mxu1 %vm852_vm3, %v3777_v58  ;;  %4750 = vst [vmem:[#allocation13_spill] sm:$0xff] %v4513_v41 }
 0x17c   : > { %v2852_v15 = vpop.permute.xlu1 %2851 }
 0x17d   : > { %2894 = vxpose.xlu1.b32.cont [6/16] (narrow) %v2852_v15, 8  ;;  %v4515_v30 = vpop.permute.xlu0 %2966 }
 0x17e   : > { %4751 = vst [vmem:[#allocation14_spill] sm:$0xff] %v4515_v30 }
 0x180   : > { %v2854_v37 = vpop.permute.xlu1 %2853 }
 0x181   : > { %2895 = vxpose.xlu1.b32.cont [7/16] (narrow) %v2854_v37, 8  ;;  %3672 = vmatmul.mubr.msk.bf16.gmra.mxu1 %vm852_vm3, %v3778_v28  ;;  %v4517_v62 = vpop.permute.xlu0 %2962 }
 0x182   : > { %4752 = vst [vmem:[#allocation15_spill] sm:$0xff] %v4517_v62 }
 0x184   : > { %v2856_v51 = vpop.permute.xlu1 %2855 }
 0x185   : > { %2896 = vxpose.xlu1.b32.cont [8/16] (narrow) %v2856_v51, 8  ;;  %v4519_v59 = vpop.permute.xlu0 %2968 }
 0x186   : > { %4753 = vst [vmem:[#allocation16_spill] sm:$0xff] %v4519_v59 }
 0x188   : > { %v2858_v14 = vpop.permute.xlu1 %2857 }
 0x189   : > { %2897 = vxpose.xlu1.b32.cont [9/16] (narrow) %v2858_v14, 8  ;;  %v4521_v21 = vpop.permute.xlu0 %2964 }
 0x18a   : > { %4754 = vst [vmem:[#allocation17_spill] sm:$0xff] %v4521_v21 }
 0x18c   : > { %v2860_v44 = vpop.permute.xlu1 %2859 }
 0x18d   : > { %2898 = vxpose.xlu1.b32.cont [10/16] (narrow) %v2860_v44, 8  ;;  %v2870_v42 = vpop.permute.xlu0 %2869 }
 0x190   : > { %v2862_v57 = vpop.permute.xlu1 %2861 }
 0x191   : > { %2899 = vxpose.xlu1.b32.cont [11/16] (narrow) %v2862_v57, 8 }
 0x194   : > { %v2864_v48 = vpop.permute.xlu1 %2863 }
 0x195   : > { %2900 = vxpose.xlu1.b32.cont [12/16] (narrow) %v2864_v48, 8 }
 0x198   : > { %v2866_v20 = vpop.permute.xlu1 %2865 }
 0x199   : > { %2901 = vxpose.xlu1.b32.cont [13/16] (narrow) %v2866_v20, 8 }
 0x19c   : > { %v2872_v16 = vpop.permute.xlu1 %2871 }
 0x1a0   : > { %v2868_v23 = vpop.permute.xlu1 %2867 }
 0x1a1   : > { %2902 = vxpose.xlu1.b32.cont [14/16] (narrow) %v2868_v23, 8 }
 0x1a5   : > { %2903 = vxpose.xlu1.b32.cont [15/16] (narrow) %v2870_v42, 8 }
 0x1a9   : > { %v3485_v18 = vpop.f32.mrf.mxu1  ;;  %2904 = vxpose.xlu1.b32.end [16/16] (narrow) %v2872_v16, 8 }
 0x1aa   : > { %v1072_v20 = vadd.f32 %v3507_v52, %v3485_v18 }
 0x1ab   : > { %v914_v24 = vpop.f32.mrf.mxu1 }
 0x1ad   : > { %v3486_v38 = vpop.f32.mrf.mxu1 }
 0x1af   : > { %v3511_v54 = vpop.f32.mrf.mxu0  ;;  %v917_v1 = vpop.f32.mrf.mxu1 }
 0x1b0   : > { %v1067_v0 = vadd.f32 %v1066_v49, %v917_v1  ;;  %v1064_v49 = vadd.f32 %v1063_v50, %v914_v24 }
 0x1b1   : > { %v1079_v27 = vpop.f32.mrf.mxu0  ;;  %v3489_v25 = vpop.f32.mrf.mxu1 }
 0x1b2   : > { %v1088_v45 = vadd.f32 %v3511_v54, %v3489_v25  ;;  %v1075_v25 = vadd.f32 %v3508_v9, %v3486_v38 }
 0x1b3   : > { %v3512_v61 = vpop.f32.mrf.mxu0  ;;  %v930_v4 = vpop.f32.mrf.mxu1 }
 0x1b4   : > { %v1080_v53 = vadd.f32 %v1079_v27, %v930_v4 }
 0x1b5   : > { %v1082_v56 = vpop.f32.mrf.mxu0  ;;  %v3490_v60 = vpop.f32.mrf.mxu1 }
 0x1b6   : > { %v1091_v22 = vadd.f32 %v3512_v61, %v3490_v60 }
 0x1b7   : > { %v3515_v40 = vpop.f32.mrf.mxu0  ;;  %v933_v6 = vpop.f32.mrf.mxu1 }
 0x1b8   : > { %v1083_v43 = vadd.f32 %v1082_v56, %v933_v6 }
 0x1b9   : > { %v1095_v12 = vpop.f32.mrf.mxu0  ;;  %v3493_v10 = vpop.f32.mrf.mxu1 }
 0x1ba   : > { %v1104_v17 = vadd.f32 %v3515_v40, %v3493_v10 }
 0x1bb   : > { %v3516_v11 = vpop.f32.mrf.mxu0  ;;  %v946_v36 = vpop.f32.mrf.mxu1 }
 0x1bc   : > { %v1096_v26 = vadd.f32 %v1095_v12, %v946_v36 }
 0x1bd   : > { %v1098_v34 = vpop.f32.mrf.mxu0  ;;  %v3494_v13 = vpop.f32.mrf.mxu1 }
 0x1be   : > { %v1107_v19 = vadd.f32 %v3516_v11, %v3494_v13 }
 0x1bf   : > { %v949_v31 = vpop.f32.mrf.mxu1 }
 0x1c0   : > { %v3519_v8 = vpop.f32.mrf.mxu0  ;;  %v1099_v58 = vadd.f32 %v1098_v34, %v949_v31 }
 0x1c1   : > { %v3497_v46 = vpop.f32.mrf.mxu1 }
 0x1c2   : > { %v1111_v3 = vpop.f32.mrf.mxu0  ;;  %v1120_v15 = vadd.f32 %v3519_v8, %v3497_v46 }
 0x1c3   : > { %v962_v28 = vpop.f32.mrf.mxu1 }
 0x1c4   : > { %v3520_v37 = vpop.f32.mrf.mxu0  ;;  %v1112_v51 = vadd.f32 %v1111_v3, %v962_v28 }
 0x1c5   : > { %v3498_v14 = vpop.f32.mrf.mxu1 }
 0x1c6   : > { %v1114_v44 = vpop.f32.mrf.mxu0  ;;  %v1123_v57 = vadd.f32 %v3520_v37, %v3498_v14 }
 0x1c7   : > { %v965_v48 = vpop.f32.mrf.mxu1 }
 0x1c8   : > { %v3551_v16 = vpop.f32.mrf.mxu0  ;;  %v1115_v23 = vadd.f32 %v1114_v44, %v965_v48 }
 0x1c9   : > { %v3529_v42 = vpop.f32.mrf.mxu1 }
 0x1ca   : > { %v4523_v54 = vpop.f32.mrf.mxu0  ;;  %v1329_v1 = vadd.f32 %v3529_v42, %v1072_v20 }
 0x1cb   : > { %v1264_v27 = vpop.f32.mrf.mxu1 }
 0x1cc   : > { %v3552_v61 = vpop.f32.mrf.mxu0  ;;  %v4525_v4 = vadd.f32 %v1264_v27, %v1064_v49  ;;  %v1546_v56 = vadd.f32 %v3551_v16, %v1329_v1 }
 0x1cd   : > { %v3530_v60 = vpop.f32.mrf.mxu1 }
 0x1ce   : > { %v4527_v40 = vpop.f32.mrf.mxu0  ;;  %v1330_v6 = vadd.f32 %v3530_v60, %v1075_v25  ;;  %v1544_v59 = vadd.f32 %v4523_v54, %v4525_v4 }
 0x1cf   : > { %v1267_v12 = vpop.f32.mrf.mxu1 }
 0x1d0   : > { %v3555_v10 = vpop.f32.mrf.mxu0  ;;  %v4529_v52 = vadd.f32 %v1267_v12, %v1067_v0  ;;  %v1547_v18 = vadd.f32 %v3552_v61, %v1330_v6 }
 0x1d1   : > { %v3533_v11 = vpop.f32.mrf.mxu1 }
 0x1d2   : > { %v1497_v50 = vpop.f32.mrf.mxu0  ;;  %v1333_v24 = vadd.f32 %v3533_v11, %v1088_v45  ;;  %v1545_v39 = vadd.f32 %v4527_v40, %v4529_v52 }
 0x1d3   : > { %v1280_v36 = vpop.f32.mrf.mxu1 }
 0x1d4   : > { %v3556_v34 = vpop.f32.mrf.mxu0  ;;  %v1331_v13 = vadd.f32 %v1280_v36, %v1080_v53  ;;  %v1550_v9 = vadd.f32 %v3555_v10, %v1333_v24 }
 0x1d5   : > { %v3534_v38 = vpop.f32.mrf.mxu1 }
 0x1d6   : > { %v1500_v31 = vpop.f32.mrf.mxu0  ;;  %v1334_v8 = vadd.f32 %v3534_v38, %v1091_v22  ;;  %v1548_v46 = vadd.f32 %v1497_v50, %v1331_v13 }
 0x1d7   : > { %v1283_v3 = vpop.f32.mrf.mxu1 }
 0x1d8   : > { %v3559_v28 = vpop.f32.mrf.mxu0  ;;  %v1332_v37 = vadd.f32 %v1283_v3, %v1083_v43  ;;  %v1551_v14 = vadd.f32 %v3556_v34, %v1334_v8 }
 0x1d9   : > { %v3537_v44 = vpop.f32.mrf.mxu1 }
 0x1da   : > { %v1513_v48 = vpop.f32.mrf.mxu0  ;;  %v1337_v0 = vadd.f32 %v3537_v44, %v1104_v17  ;;  %v1549_v20 = vadd.f32 %v1500_v31, %v1332_v37 }
 0x1db   : > { %v1296_v16 = vpop.f32.mrf.mxu1 }
 0x1dc   : > { %v3560_v42 = vpop.f32.mrf.mxu0  ;;  %v1335_v49 = vadd.f32 %v1296_v16, %v1096_v26  ;;  %v1554_v45 = vadd.f32 %v3559_v28, %v1337_v0 }
 0x1dd   : > { %v3538_v1 = vpop.f32.mrf.mxu1 }
 0x1de   : > { %v1516_v27 = vpop.f32.mrf.mxu0  ;;  %v1338_v53 = vadd.f32 %v3538_v1, %v1107_v19  ;;  %v1552_v25 = vadd.f32 %v1513_v48, %v1335_v49 }
 0x1df   : > { %v1299_v61 = vpop.f32.mrf.mxu1 }
 0x1e0   : > { %v3563_v60 = vpop.f32.mrf.mxu0  ;;  %v1336_v22 = vadd.f32 %v1299_v61, %v1099_v58  ;;  %v1555_v6 = vadd.f32 %v3560_v42, %v1338_v53 }
 0x1e1   : > { %v3541_v12 = vpop.f32.mrf.mxu1 }
 0x1e2   : > { %v1529_v10 = vpop.f32.mrf.mxu0  ;;  %v1341_v43 = vadd.f32 %v3541_v12, %v1120_v15  ;;  %v1553_v11 = vadd.f32 %v1516_v27, %v1336_v22 }
 0x1e3   : > { %v1312_v50 = vpop.f32.mrf.mxu1 }
 0x1e4   : > { %v3564_v24 = vpop.f32.mrf.mxu0  ;;  %v1339_v17 = vadd.f32 %v1312_v50, %v1112_v51  ;;  %v1558_v36 = vadd.f32 %v3563_v60, %v1341_v43 }
 0x1e5   : > { %v3542_v34 = vpop.f32.mrf.mxu1 }
 0x1e6   : > { %v1532_v13 = vpop.f32.mrf.mxu0  ;;  %v1342_v26 = vadd.f32 %v3542_v34, %v1123_v57  ;;  %v1556_v38 = vadd.f32 %v1529_v10, %v1339_v17 }
 0x1e7   : > { %v1315_v31 = vpop.f32.mrf.mxu1 }
 0x1e8   : > { %v4531_v8 = vpop.f32.mrf.mxu0  ;;  %v1340_v19 = vadd.f32 %v1315_v31, %v1115_v23  ;;  %v1559_v3 = vadd.f32 %v3564_v24, %v1342_v26 }
 0x1e9   : > { %v3573_v28 = vpop.f32.mrf.mxu1 }
 0x1ea   : > { %v4533_v58 = vpop.f32.mrf.mxu0  ;;  %v4535_v37 = vadd.f32 %v3573_v28, %v1546_v56  ;;  %v1557_v15 = vadd.f32 %v1532_v13, %v1340_v19 }
 0x1eb   : > { %v1698_v44 = vpop.f32.mrf.mxu1 }
 0x1ec   : > { %v4537_v48 = vpop.f32.mrf.mxu0  ;;  %v1761_v21 = vadd.f32 %v1698_v44, %v1544_v59  ;;  %v1980_v59 = vadd.f32 %v4531_v8, %v4535_v37 }
 0x1ed   : > { %v3574_v51 = vpop.f32.mrf.mxu1 }
 0x1ee   : > { %v4539_v0 = vpop.f32.mrf.mxu0  ;;  %v4541_v16 = vadd.f32 %v3574_v51, %v1547_v18  ;;  %v1978_v33 = vadd.f32 %v4533_v58, %v1761_v21 }
 0x1ef   : > { %v1701_v57 = vpop.f32.mrf.mxu1 }
 0x1f0   : > { %v4543_v42 = vpop.f32.mrf.mxu0  ;;  %v1762_v29 = vadd.f32 %v1701_v57, %v1545_v39  ;;  %v1981_v39 = vadd.f32 %v4537_v48, %v4541_v16 }
 0x1f1   : > { %v3577_v49 = vpop.f32.mrf.mxu1 }
 0x1f2   : > { %v4545_v23 = vpop.f32.mrf.mxu0  ;;  %v4547_v1 = vadd.f32 %v3577_v49, %v1550_v9  ;;  %v1979_v54 = vadd.f32 %v4539_v0, %v1762_v29 }
 0x1f3   : > { %v1714_v27 = vpop.f32.mrf.mxu1 }
 0x1f4   : > { %v4549_v56 = vadd.f32 %v1714_v27, %v1548_v46  ;;  %v4551_v53 = vpop.f32.mrf.mxu0 }
 0x1f5   : > { %v3578_v61 = vpop.f32.mrf.mxu1 }
 0x1f6   : > { %v4553_v60 = vadd.f32 %v3578_v61, %v1551_v14  ;;  %v4557_v18 = vpop.f32.mrf.mxu0 }
 0x1f7   : > { %v1717_v22 = vpop.f32.mrf.mxu1 }
 0x1f8   : > { %v4555_v12 = vadd.f32 %v1717_v22, %v1549_v20  ;;  %v4563_v9 = vpop.f32.mrf.mxu0 }
 0x1f9   : > { %v3581_v10 = vpop.f32.mrf.mxu1 }
 0x1fa   : > { %v4559_v43 = vadd.f32 %v3581_v10, %v1554_v45  ;;  %v4569_v14 = vpop.f32.mrf.mxu0 }
 0x1fb   : > { %v1730_v50 = vpop.f32.mrf.mxu1 }
 0x1fc   : > { %v4561_v24 = vadd.f32 %v1730_v50, %v1552_v25  ;;  %v4575_v45 = vpop.f32.mrf.mxu0 }
 0x1fd   : > { %v3582_v46 = vpop.f32.mrf.mxu1 }
 0x1fe   : > { %v4565_v17 = vadd.f32 %v3582_v46, %v1555_v6  ;;  %v4581_v6 = vpop.f32.mrf.mxu0 }
 0x1ff   : > { %v1733_v34 = vpop.f32.mrf.mxu1 }
 0x200   : > { %v4567_v13 = vadd.f32 %v1733_v34, %v1553_v11  ;;  %v4583_v61 = vpop.f32.mrf.mxu0 }
 0x201   : > { %v3585_v20 = vpop.f32.mrf.mxu1 }
 0x202   : > { %v4571_v26 = vadd.f32 %v3585_v20, %v1558_v36  ;;  %v4585_v10 = vpop.f32.mrf.mxu0 }
 0x203   : > { %v1746_v31 = vpop.f32.mrf.mxu1 }
 0x204   : > { %v4573_v19 = vadd.f32 %v1746_v31, %v1556_v38  ;;  %v4589_v46 = vpop.f32.mrf.mxu0 }
 0x205   : > { %v3586_v25 = vpop.f32.mrf.mxu1 }
 0x206   : > { %v4577_v28 = vadd.f32 %v3586_v25, %v1559_v3 }
 0x207   : > { %v1749_v51 = vpop.f32.mrf.mxu1 }
 0x208   : > { %v4579_v49 = vadd.f32 %v1749_v51, %v1557_v15  ;;  %v4593_v15 = vpop.f32.mrf.mxu0 }
 0x209   : > { %v3617_v11 = vpop.f32.mrf.mxu1 }
 0x20a   : > { %v3639_v25 = vpop.f32.mrf.mxu0  ;;  %v2197_v5 = vadd.f32 %v3617_v11, %v1980_v59 }
 0x20b   : > { %v2132_v27 = vpop.f32.mrf.mxu1 }
 0x20c   : > { %v2349_v62 = vpop.f32.mrf.mxu0  ;;  %v2195_v2 = vadd.f32 %v2132_v27, %v1978_v33  ;;  %v4624_v33 = vld [vmem:[%s4735_s7] ss:$0 sm:$0xff]  ;;  %v2414_v37 = vadd.f32 %v3639_v25, %v2197_v5 }
 0x20d   : > { %v3618_v22 = vpop.f32.mrf.mxu1 }
 0x20e   : > { %v3640_v7 = vpop.f32.mrf.mxu0  ;;  %v2412_v52 = vadd.f32 %v2349_v62, %v2195_v2  ;;  %v2198_v8 = vadd.f32 %v3618_v22, %v1981_v39  ;;  %v4630_v2 = vld [vmem:[%s4736_s8] ss:$0 sm:$0xff] }
 0x20f   : > { %v2135_v36 = vpop.f32.mrf.mxu1 }
 0x210   : > { %v2352_v4 = vpop.f32.mrf.mxu0  ;;  %v2196_v40 = vadd.f32 %v2135_v36, %v1979_v54  ;;  %v2415_v36 = vadd.f32 %v3640_v7, %v2198_v8  ;;  %v1983_v54 = vadd.f32 %v4557_v18, %v4555_v12  ;;  %v1984_v7 = vadd.f32 %v4543_v42, %v4547_v1 }
 0x211   : > { %v4587_v38 = vpop.f32.mrf.mxu1  ;;  %v1985_v42 = vadd.f32 %v4551_v53, %v4553_v60 }
 0x212   : > { %v3643_v58 = vpop.f32.mrf.mxu0  ;;  %v2413_v0 = vadd.f32 %v2352_v4, %v2196_v40 }
 0x213   : > { %v2148_v50 = vpop.f32.mrf.mxu1 }
 0x214   : > { %v2365_v27 = vpop.f32.mrf.mxu0 }
 0x215   : > { %v4591_v3 = vpop.f32.mrf.mxu1 }
 0x217   : > { %v2151_v34 = vpop.f32.mrf.mxu1 }
 0x219   : > { %v4595_v20 = vpop.f32.mrf.mxu1 }
 0x21b   : > { %v4597_v31 = vpop.f32.mrf.mxu1 }
 0x21d   : > { %v4599_v51 = vpop.f32.mrf.mxu1 }
 0x21f   : > { %v4603_v30 = vpop.f32.mrf.mxu1 }
 0x221   : > { %v4605_v47 = vpop.f32.mrf.mxu1 }
 0x223   : > { %v4609_v41 = vpop.f32.mrf.mxu1 }
 0x225   : > { %v4612_v35 = vpop.f32.mrf.mxu1 }
 0x227   : > { %v4614_v63 = vpop.f32.mrf.mxu1 }
 0x229   : > { %v3661_v44 = vpop.f32.mrf.mxu1 }
 0x22a   : > { %v2631_v62 = vadd.f32 %v3661_v44, %v2414_v37 }
 0x22b   : > { %v2566_v32 = vpop.f32.mrf.mxu1 }
 0x22c   : > { %v2629_v21 = vadd.f32 %v2566_v32, %v2412_v52  ;;  %v1982_v32 = vadd.f32 %v4545_v23, %v4549_v56  ;;  %v2702_v4 = vmul.f32 %v4624_v33, %v2631_v62  ;;  %v3644_v56 = vpop.f32.mrf.mxu0  ;;  %v2200_v52 = vadd.f32 %v2151_v34, %v1983_v54  ;;  %v2905_v34 = vpop.trf.xlu1 }
 0x22d   : > { %v3662_v57 = vpop.f32.mrf.mxu1  ;;  %2921 = vst [vmem:[%s4649_s12 + $0x20] sm:$0xff] %v2905_v34 }
 0x22e   : > { %v2700_v29 = vmul.f32 %v4624_v33, %v2629_v21  ;;  %v2199_v5 = vadd.f32 %v2148_v50, %v1982_v32  ;;  %v2632_v40 = vadd.f32 %v3662_v57, %v2415_v36  ;;  %v2725_v8 = vadd.f32 %v4630_v2, %v2702_v4  ;;  %v2368_v12 = vpop.f32.mrf.mxu0 }
 0x22f   : > { %v2569_v11 = vpop.f32.mrf.mxu1  ;;  %v2201_v57 = vadd.f32 %v4587_v38, %v1984_v7  ;;  %v2417_v37 = vadd.f32 %v2368_v12, %v2200_v52  ;;  %v2202_v32 = vadd.f32 %v4591_v3, %v1985_v42 }
 0x230   : > { %v2630_v48 = vadd.f32 %v2569_v11, %v2413_v0  ;;  %v2723_v16 = vadd.f32 %v4630_v2, %v2700_v29  ;;  %v2416_v39 = vadd.f32 %v2365_v27, %v2199_v5  ;;  %v2703_v50 = vmul.f32 %v4624_v33, %v2632_v40  ;;  %v3647_v11 = vpop.f32.mrf.mxu0 }
 0x231   : > { %v3665_v22 = vpop.f32.mrf.mxu1  ;;  %v2418_v62 = vadd.f32 %v3643_v58, %v2201_v57  ;;  %v1988_v40 = vadd.f32 %v4563_v9, %v4559_v43 }
 0x232   : > { %v2701_v25 = vmul.f32 %v4624_v33, %v2630_v48  ;;  %2739 = vxpose.xlu0.b32.start [1/16] (narrow) %v2723_v16, 32  ;;  %v2726_v0 = vadd.f32 %v4630_v2, %v2703_v50  ;;  %v1986_v48 = vadd.f32 %v4569_v14, %v4561_v24  ;;  %v2381_v60 = vpop.f32.mrf.mxu0 }
 0x233   : > { %v2582_v59 = vpop.f32.mrf.mxu1  ;;  %v2635_v16 = vadd.f32 %v3665_v22, %v2418_v62 }
 0x234   : > { %v2724_v23 = vadd.f32 %v4630_v2, %v2701_v25  ;;  %v2633_v21 = vadd.f32 %v2582_v59, %v2416_v39  ;;  %v2203_v36 = vadd.f32 %v4597_v31, %v1986_v48  ;;  %v2419_v25 = vadd.f32 %v3644_v56, %v2202_v32  ;;  %v3648_v24 = vpop.f32.mrf.mxu0 }
 0x235   : > { %v3666_v44 = vpop.f32.mrf.mxu1  ;;  %v1987_v59 = vadd.f32 %v4581_v6, %v4567_v13  ;;  %v2706_v3 = vmul.f32 %v4624_v33, %v2635_v16 }
 0x236   : > { %2740 = vxpose.xlu0.b32.cont [2/16] (narrow) %v2724_v23, 32  ;;  %v2704_v1 = vmul.f32 %v4624_v33, %v2633_v21  ;;  %v2636_v58 = vadd.f32 %v3666_v44, %v2419_v25  ;;  %v2420_v4 = vadd.f32 %v2381_v60, %v2203_v36  ;;  %v2384_v13 = vpop.f32.mrf.mxu0  ;;  %v2205_v44 = vadd.f32 %v4595_v20, %v1988_v40  ;;  %v4761_v40 = vld [vmem:[#allocation8_spill] sm:$0xff] }
 0x237   : > { %v2585_v18 = vpop.f32.mrf.mxu1  ;;  %v2204_v22 = vadd.f32 %v4603_v30, %v1987_v59  ;;  %v2729_v56 = vadd.f32 %v4630_v2, %v2706_v3  ;;  %v1989_v30 = vadd.f32 %v4575_v45, %v4565_v17  ;;  %v1990_v20 = vadd.f32 %v4585_v10, %v4573_v19 }
 0x238   : > { %v2634_v29 = vadd.f32 %v2585_v18, %v2417_v37  ;;  %v2727_v53 = vadd.f32 %v4630_v2, %v2704_v1  ;;  %v2707_v31 = vmul.f32 %v4624_v33, %v2636_v58  ;;  %v3651_v39 = vpop.f32.mrf.mxu0 }
 0x239   : > { %v3669_v38 = vpop.f32.mrf.mxu1  ;;  %v2421_v52 = vadd.f32 %v2384_v13, %v2204_v22  ;;  %v2206_v21 = vadd.f32 %v4599_v51, %v1989_v30  ;;  %v2207_v45 = vadd.f32 %v4609_v41, %v1990_v20  ;;  %v1991_v51 = vadd.f32 %v4593_v15, %v4579_v49  ;;  %v4758_v22 = vld [vmem:[#allocation7_spill] sm:$0xff]  ;;  %v4767_v13 = vld [vmem:[#allocation17_spill] sm:$0xff] }
 0x23a   : > { %2741 = vxpose.xlu0.b32.cont [3/16] (narrow) %v2725_v8, 32  ;;  %v2705_v27 = vmul.f32 %v4624_v33, %v2634_v29  ;;  %v2730_v43 = vadd.f32 %v4630_v2, %v2707_v31  ;;  %v2422_v8 = vadd.f32 %v3647_v11, %v2205_v44  ;;  %v2397_v12 = vpop.f32.mrf.mxu0  ;;  %v1992_v41 = vadd.f32 %v4583_v61, %v4571_v26  ;;  %v4764_v31 = vld [vmem:[#allocation10_spill] sm:$0xff]  ;;  %v4769_v44 = vld [vmem:[#allocation16_spill] sm:$0xff] }
 0x23b   : > { %v2598_v5 = vpop.f32.mrf.mxu1  ;;  %v2423_v34 = vadd.f32 %v3648_v24, %v2206_v21  ;;  %v2424_v10 = vadd.f32 %v2397_v12, %v2207_v45  ;;  %v2208_v11 = vadd.f32 %v4614_v63, %v1991_v51  ;;  %v4756_v24 = vld [vmem:[#allocation3_spill] sm:$0xff] }
 0x23c   : > { %v2728_v54 = vadd.f32 %v4630_v2, %v2705_v27  ;;  %v2637_v23 = vadd.f32 %v2598_v5, %v2420_v4  ;;  %v2639_v18 = vadd.f32 %v3669_v38, %v2422_v8  ;;  %v3652_v42 = vpop.f32.mrf.mxu0  ;;  %v2209_v15 = vadd.f32 %v4605_v47, %v1992_v41  ;;  %v4759_v4 = vld [vmem:[#allocation9_spill] sm:$0xff] }
 0x23d   : > { %v3670_v14 = vpop.f32.mrf.mxu1  ;;  %v1993_v27 = vadd.f32 %v4589_v46, %v4577_v28 }
 0x23e   : > { %2742 = vxpose.xlu0.b32.cont [4/16] (narrow) %v2726_v0, 32  ;;  %v2708_v7 = vmul.f32 %v4624_v33, %v2637_v23  ;;  %v2710_v1 = vmul.f32 %v4624_v33, %v2639_v18  ;;  %v2640_v29 = vadd.f32 %v3670_v14, %v2423_v34  ;;  %v2400_v38 = vpop.f32.mrf.mxu0  ;;  %v2426_v5 = vadd.f32 %v3651_v39, %v2209_v15  ;;  %v4757_v14 = vld [vmem:[#allocation4_spill] sm:$0xff] }
 0x23f   : > { %v2601_v6 = vpop.f32.mrf.mxu1  ;;  %v2425_v16 = vadd.f32 %v2400_v38, %v2208_v11  ;;  %v2210_v26 = vadd.f32 %v4612_v35, %v1993_v27  ;;  %v4765_v23 = vld [vmem:[#allocation12_spill] sm:$0xff] }
 0x240   : > { %v2638_v50 = vadd.f32 %v2601_v6, %v2421_v52  ;;  %v2731_v37 = vadd.f32 %v4630_v2, %v2708_v7  ;;  %v2711_v32 = vmul.f32 %v4624_v33, %v2640_v29  ;;  %v2733_v48 = vadd.f32 %v4630_v2, %v2710_v1  ;;  %v4768_v6 = vld [vmem:[#allocation14_spill] sm:$0xff] }
 0x241   : > { %v3673_v9 = vpop.f32.mrf.mxu1  ;;  %v2427_v47 = vadd.f32 %v3652_v42, %v2210_v26 }
 0x242   : > { %2743 = vxpose.xlu0.b32.cont [5/16] (narrow) %v2727_v53, 32  ;;  %v2709_v57 = vmul.f32 %v4624_v33, %v2638_v50  ;;  %v2734_v60 = vadd.f32 %v4630_v2, %v2711_v32  ;;  %v2643_v61 = vadd.f32 %v3673_v9, %v2426_v5 }
 0x243   : > { %v2614_v17 = vpop.f32.mrf.mxu1 }
 0x244   : > { %v2732_v0 = vadd.f32 %v4630_v2, %v2709_v57  ;;  %v2641_v62 = vadd.f32 %v2614_v17, %v2424_v10  ;;  %v2714_v59 = vmul.f32 %v4624_v33, %v2643_v61 }
 0x245   : > { %v3674_v19 = vpop.f32.mrf.mxu1 }
 0x246   : > { %2744 = vxpose.xlu0.b32.cont [6/16] (narrow) %v2728_v54, 32  ;;  %v2712_v63 = vmul.f32 %v4624_v33, %v2641_v62  ;;  %v2644_v3 = vadd.f32 %v3674_v19, %v2427_v47  ;;  %v2737_v58 = vadd.f32 %v4630_v2, %v2714_v59  ;;  %v4755_v54 = vld [vmem:[#allocation5_spill] sm:$0xff] }
 0x247   : > { %v2617_v49 = vpop.f32.mrf.mxu1 }
 0x248   : > { %v2642_v53 = vadd.f32 %v2617_v49, %v2425_v16  ;;  %v2735_v25 = vadd.f32 %v4630_v2, %v2712_v63  ;;  %v2715_v46 = vmul.f32 %v4624_v33, %v2644_v3 }
 0x24a   : > { %2745 = vxpose.xlu0.b32.cont [7/16] (narrow) %v2729_v56, 32  ;;  %v2713_v36 = vmul.f32 %v4624_v33, %v2642_v53  ;;  %v2738_v35 = vadd.f32 %v4630_v2, %v2715_v46  ;;  %v4760_v33 = vld [vmem:[#allocation6_spill] sm:$0xff]  ;;  %v4766_v56 = vld [vmem:[#allocation15_spill] sm:$0xff] }
 0x24c   : > { %v2736_v28 = vadd.f32 %v4630_v2, %v2713_v36  ;;  %v4762_v2 = vld [vmem:[#allocation11_spill] sm:$0xff] }
 0x24e   : > { %2746 = vxpose.xlu0.b32.cont [8/16] (narrow) %v2730_v43, 32 }
 0x252   : > { %2747 = vxpose.xlu0.b32.cont [9/16] (narrow) %v2731_v37, 32 }
 0x256   : > { %2748 = vxpose.xlu0.b32.cont [10/16] (narrow) %v2732_v0, 32 }
 0x25a   : > { %2749 = vxpose.xlu0.b32.cont [11/16] (narrow) %v2733_v48, 32 }
 0x25e   : > { %2750 = vxpose.xlu0.b32.cont [12/16] (narrow) %v2734_v60, 32 }
 0x262   : > { %2751 = vxpose.xlu0.b32.cont [13/16] (narrow) %v2735_v25, 32 }
 0x266   : > { %2752 = vxpose.xlu0.b32.cont [14/16] (narrow) %v2736_v28, 32 }
 0x26a   : > { %2753 = vxpose.xlu0.b32.cont [15/16] (narrow) %v2737_v58, 32 }
 0x26e   : > { %2754 = vxpose.xlu0.b32.end [16/16] (narrow) %v2738_v35, 32 }
 0x272   : > { %2986 = vxpose.xlu0.b32.start [1/16] (narrow) %v4475_v55, 8  ;;  %v4763_v55 = vld [vmem:[#allocation13_spill] sm:$0xff] }
 0x276   : > { %2987 = vxpose.xlu0.b32.cont [2/16] (narrow) %v4755_v54, 8 }
 0x27a   : > { %2988 = vxpose.xlu0.b32.cont [3/16] (narrow) %v4756_v24, 8 }
 0x27e   : > { %2989 = vxpose.xlu0.b32.cont [4/16] (narrow) %v4757_v14, 8 }
 0x282   : > { %2990 = vxpose.xlu0.b32.cont [5/16] (narrow) %v4758_v22, 8 }
 0x286   : > { %2991 = vxpose.xlu0.b32.cont [6/16] (narrow) %v4759_v4, 8 }
 0x28a   : > { %2992 = vxpose.xlu0.b32.cont [7/16] (narrow) %v4760_v33, 8 }
 0x28e   : > { %2993 = vxpose.xlu0.b32.cont [8/16] (narrow) %v4761_v40, 8 }
 0x292   : > { %2994 = vxpose.xlu0.b32.cont [9/16] (narrow) %v4762_v2, 8 }
 0x296   : > { %2995 = vxpose.xlu0.b32.cont [10/16] (narrow) %v4763_v55, 8 }
 0x29a   : > { %2996 = vxpose.xlu0.b32.cont [11/16] (narrow) %v4764_v31, 8 }
 0x29e   : > { %2997 = vxpose.xlu0.b32.cont [12/16] (narrow) %v4765_v23, 8 }
 0x2a2   : > { %2998 = vxpose.xlu0.b32.cont [13/16] (narrow) %v4766_v56, 8 }
 0x2a6   : > { %2999 = vxpose.xlu0.b32.cont [14/16] (narrow) %v4767_v13, 8 }
 0x2aa   : > { %3000 = vxpose.xlu0.b32.cont [15/16] (narrow) %v4768_v6, 8 }
 0x2ae   : > { %3001 = vxpose.xlu0.b32.end [16/16] (narrow) %v4769_v44, 8  ;;  %v2755_v52 = vpop.trf.xlu0 }
 0x2af   : > { %2771 = vst [vmem:[%s4649_s12] sm:$0xff] %v2755_v52 }
 0x2b2   : > { %v2756_v39 = vpop.trf.xlu0 }
 0x2b3   : > { %2772 = vst [vmem:[%s4649_s12 + $0x8] sm:$0xff] %v2756_v39 }
 0x2b6   : > { %v2757_v30 = vpop.trf.xlu0 }
 0x2b7   : > { %2773 = vst [vmem:[%s4649_s12 + $0x10] sm:$0xff] %v2757_v30 }
 0x2ba   : > { %v2758_v7 = vpop.trf.xlu0 }
 0x2bb   : > { %2774 = vst [vmem:[%s4649_s12 + $0x18] sm:$0xff] %v2758_v7 }
 0x2ee   : > { %v3002_v50 = vpop.trf.xlu0 }
 0x2ef   : > { %3018 = vst [vmem:[%s4649_s12 + $0x28] sm:$0xff] %v3002_v50 }
 0x2f0 PF: > { %s21_s17 = sadd.s32 1, %s3785_s17  }
 0x2f1   : > { %p18_p4 = scmp.ge.s32.totalorder %s21_s17, 4  }
 0x2f3   :  { %20 = sbr.rel (!%p18_p4) target bundleno = 1 (0x1), region = 102 }

</bundles_post_ra>
